<compile_context>
chip_gen: v7x
topology: tpu7x:2x2x1
jax: 0.10.0
libtpu: 0.0.40
codegen_flags: <defaults>
</compile_context>

<pallas_src>
import functools

import jax
import jax.numpy as jnp
from jax.experimental import pallas as pl
from jax.experimental.pallas import tpu as pltpu


HIDDEN = 256
ACT_PAD = 128   # action_out padded to a full lane width for MXU/store efficiency
SMALL_B = 512   # up to this batch the whole forward is a single grid step


def actor_mlp_kernel(x_ref, w1_ref, b1_ref, w2_ref, b2_ref,
                     w3_ref, b3_ref, w4_ref, b4_ref, out_ref, *, max_action):
    # x arrives f32; cast to bf16 in-kernel (saves a wrapper HLO).  All matmuls use
    # bf16 operands with f32 accumulation (MXU); bias add / ReLU / tanh run in f32
    # (safe on v5e which has no bf16 VPU/EUP path).
    x = x_ref[...].astype(jnp.bfloat16)

    h = jnp.dot(x, w1_ref[...], preferred_element_type=jnp.float32) + b1_ref[...]
    h = jnp.maximum(h, 0.0)

    h = jnp.dot(h.astype(jnp.bfloat16), w2_ref[...],
                preferred_element_type=jnp.float32) + b2_ref[...]
    h = jnp.maximum(h, 0.0)

    h = jnp.dot(h.astype(jnp.bfloat16), w3_ref[...],
                preferred_element_type=jnp.float32) + b3_ref[...]
    h = jnp.maximum(h, 0.0)

    a = jnp.dot(h.astype(jnp.bfloat16), w4_ref[...],
                preferred_element_type=jnp.float32) + b4_ref[...]
    # max_action * tanh(.) in f32 (EUP).  Padded action lanes are exactly 0
    # (w4p / b4p are zero-filled there), so the (tile_b, 128) store is lane-dense.
    out_ref[...] = (max_action * jnp.tanh(a)).astype(out_ref.dtype)


def _round_up(n, m):
    return ((n + m - 1) // m) * m


def actor_forward(x, params, max_action, action_dim):
    """x: (B, obs+goal) float32. Returns actions: (B, action_dim) float32."""
    w1, b1, w2, b2, w3, b3, w4p, b4p = params
    B, in_dim = x.shape
    hidden = w1.shape[1]
    act_pad = w4p.shape[1]

    if B <= SMALL_B:
        # One grid step, block == full batch.  block_shape equal to the full array
        # dim is always legal (no (8,128) divisibility requirement), so no wrapper
        # padding / extra HLOs are needed even for odd B.
        tile_b = B
        b_pad = B
    else:
        # Large batch: 512-row tiles fill the 256-row MXU on v6e/v7x; megacore
        # split across TensorCores via "parallel".
        tile_b = 512
        b_pad = _round_up(B, tile_b)

    x_p = x if b_pad == B else jnp.pad(x, ((0, b_pad - B), (0, 0)))
    num_tiles = b_pad // tile_b
    grid = (num_tiles,)

    # Weights/biases pinned in VMEM across grid steps (same block index every iter).
    pinned = lambda arr: pl.BlockSpec(arr.shape, lambda i: (0, 0))

    flops = 2 * b_pad * (in_dim * hidden + hidden * hidden * 2 + hidden * act_pad)
    bytes_accessed = (
        int(x_p.size) * 4
        + sum(int(w.size) * 2 for w in (w1, w2, w3, w4p))
        + sum(int(b.size) * 4 for b in (b1, b2, b3, b4p))
        + b_pad * act_pad * 4
    )

    out = pl.pallas_call(
        functools.partial(actor_mlp_kernel, max_action=float(max_action)),
        out_shape=jax.ShapeDtypeStruct((b_pad, act_pad), jnp.float32),
        grid=grid,
        in_specs=[
            pl.BlockSpec((tile_b, in_dim), lambda i: (i, 0)),   # x tile
            pinned(w1), pinned(b1),
            pinned(w2), pinned(b2),
            pinned(w3), pinned(b3),
            pinned(w4p), pinned(b4p),
        ],
        out_specs=pl.BlockSpec((tile_b, act_pad), lambda i: (i, 0)),
        compiler_params=pltpu.CompilerParams(
            dimension_semantics=(
                ("parallel",) if num_tiles >= 2 else ("arbitrary",)),
        ),
        cost_estimate=pl.CostEstimate(
            flops=flops, transcendentals=b_pad * act_pad,
            bytes_accessed=bytes_accessed),
    )(x_p, w1, b1, w2, b2, w3, b3, w4p, b4p)

    # Slice off batch padding (no-op when b_pad == B) and the padded action lanes.
    return out[:B, :action_dim]


def xavier_uniform(key, fan_in, fan_out):
    # Matches torch.nn.init.xavier_uniform_ with gain=1 (PyTorch weight is (out, in)).
    bound = (6.0 / (fan_in + fan_out)) ** 0.5
    w = jax.random.uniform(key, (fan_out, fan_in), jnp.float32, -bound, bound)
    return jnp.transpose(w)  # -> (in, out) for x @ W


def init_params(key, in_dim, action_dim, hidden=HIDDEN, act_pad=ACT_PAD):
    k1, k2, k3, k4 = jax.random.split(key, 4)
    w1 = xavier_uniform(k1, in_dim, hidden).astype(jnp.bfloat16)
    w2 = xavier_uniform(k2, hidden, hidden).astype(jnp.bfloat16)
    w3 = xavier_uniform(k3, hidden, hidden).astype(jnp.bfloat16)
    w4 = xavier_uniform(k4, hidden, action_dim)
    # Pad the output layer to 128 lanes (zero columns -> tanh(0)=0, sliced off later).
    w4p = jnp.zeros((hidden, act_pad), jnp.float32).at[:, :action_dim].set(w4)
    w4p = w4p.astype(jnp.bfloat16)
    # Biases kept in f32 (bias add / ReLU / tanh run in f32), shaped (1, N) to broadcast.
    b1 = jnp.zeros((1, hidden), jnp.float32)
    b2 = jnp.zeros((1, hidden), jnp.float32)
    b3 = jnp.zeros((1, hidden), jnp.float32)
    b4p = jnp.zeros((1, act_pad), jnp.float32)
    return (w1, b1, w2, b2, w3, b3, w4p, b4p)


def ref_forward(x, params, max_action, action_dim):
    # Pure-JAX reference mirroring the kernel math (bf16 operands, f32 accumulation).
    w1, b1, w2, b2, w3, b3, w4p, b4p = params
    h = x.astype(jnp.bfloat16)
    h = jnp.maximum(jnp.dot(h, w1, preferred_element_type=jnp.float32) + b1, 0.0)
    h = jnp.maximum(jnp.dot(h.astype(jnp.bfloat16), w2,
                            preferred_element_type=jnp.float32) + b2, 0.0)
    h = jnp.maximum(jnp.dot(h.astype(jnp.bfloat16), w3,
                            preferred_element_type=jnp.float32) + b3, 0.0)
    a = jnp.dot(h.astype(jnp.bfloat16), w4p,
                preferred_element_type=jnp.float32) + b4p
    return (max_action * jnp.tanh(a))[:, :action_dim]


if __name__ == "__main__":
    # env_params: obs=10, goal=3, action=4, action_max=1.0
    obs_dim, goal_dim, action_dim, max_action = 10, 3, 4, 1.0
    in_dim = obs_dim + goal_dim
    batch = 256          # small batch -> single grid step, one full (256, .) block

    key = jax.random.PRNGKey(0)
    k_params, k_x = jax.random.split(key)
    params = init_params(k_params, in_dim, action_dim)
    x = jax.random.normal(k_x, (batch, in_dim), jnp.float32)

    actions = actor_forward(x, params, max_action, action_dim)
    jax.block_until_ready(actions)

    a_ref = ref_forward(x, params, max_action, action_dim)
    assert actions.shape == (batch, action_dim)
    assert bool(jnp.all(jnp.abs(actions) <= max_action + 1e-6))
    assert jnp.allclose(actions, a_ref, atol=1e-3, rtol=1e-3)

    print("KERNEL_OK")
</pallas_src>

<mosaic_0001>
module attributes {stable_mosaic.version = 11 : i64} {
  func.func @actor_mlp_kernel(%arg0: i32, %arg1: memref<256x13xf32, #tpu.memory_space<vmem>>, %arg2: memref<13x256xbf16, #tpu.memory_space<vmem>>, %arg3: memref<1x256xf32, #tpu.memory_space<vmem>>, %arg4: memref<256x256xbf16, #tpu.memory_space<vmem>>, %arg5: memref<1x256xf32, #tpu.memory_space<vmem>>, %arg6: memref<256x256xbf16, #tpu.memory_space<vmem>>, %arg7: memref<1x256xf32, #tpu.memory_space<vmem>>, %arg8: memref<256x128xbf16, #tpu.memory_space<vmem>>, %arg9: memref<1x128xf32, #tpu.memory_space<vmem>>, %arg10: memref<256x128xf32, #tpu.memory_space<vmem>>) attributes {dimension_semantics = [#tpu.dimension_semantics<arbitrary>], iteration_bounds = array<i64: 1>, scalar_prefetch = 0 : i64, scratch_operands = 0 : i64, tpu.core_type = #tpu.core_type<tc>, window_params = [{transform_indices = @transform_0, window_bounds = array<i64: 256, 13>}, {pipeline_mode = #tpu.pipeline_mode<synchronous>, transform_indices = @transform_1, window_bounds = array<i64: 13, 256>}, {pipeline_mode = #tpu.pipeline_mode<synchronous>, transform_indices = @transform_2, window_bounds = array<i64: 1, 256>}, {pipeline_mode = #tpu.pipeline_mode<synchronous>, transform_indices = @transform_3, window_bounds = array<i64: 256, 256>}, {pipeline_mode = #tpu.pipeline_mode<synchronous>, transform_indices = @transform_4, window_bounds = array<i64: 1, 256>}, {pipeline_mode = #tpu.pipeline_mode<synchronous>, transform_indices = @transform_5, window_bounds = array<i64: 256, 256>}, {pipeline_mode = #tpu.pipeline_mode<synchronous>, transform_indices = @transform_6, window_bounds = array<i64: 1, 256>}, {pipeline_mode = #tpu.pipeline_mode<synchronous>, transform_indices = @transform_7, window_bounds = array<i64: 256, 128>}, {pipeline_mode = #tpu.pipeline_mode<synchronous>, transform_indices = @transform_8, window_bounds = array<i64: 1, 128>}, {transform_indices = @transform_9, window_bounds = array<i64: 256, 128>}]} {
    %c0 = arith.constant 0 : index
    %c0_0 = arith.constant 0 : index
    %0 = vector.load %arg1[%c0, %c0_0] : memref<256x13xf32, #tpu.memory_space<vmem>>, vector<256x13xf32>
    %1 = arith.truncf %0 : vector<256x13xf32> to vector<256x13xbf16>
    %c0_1 = arith.constant 0 : index
    %c0_2 = arith.constant 0 : index
    %2 = vector.load %arg2[%c0_1, %c0_2] : memref<13x256xbf16, #tpu.memory_space<vmem>>, vector<13x256xbf16>
    %cst = arith.constant dense<0.000000e+00> : vector<256x256xf32>
    %3 = tpu.matmul %1, %2, %cst {dimension_numbers = #tpu.dot_dimension_numbers<[1], [0], [0], [1], [0, 0, 1, 1], [], []>} : vector<256x13xbf16>, vector<13x256xbf16>, vector<256x256xf32> -> vector<256x256xf32>
    %c0_3 = arith.constant 0 : index
    %c0_4 = arith.constant 0 : index
    %4 = vector.load %arg3[%c0_3, %c0_4] : memref<1x256xf32, #tpu.memory_space<vmem>>, vector<1x256xf32>
    %5 = vector.broadcast %4 : vector<1x256xf32> to vector<256x256xf32>
    %6 = arith.addf %3, %5 : vector<256x256xf32>
    %cst_5 = arith.constant 0.000000e+00 : f32
    %7 = vector.broadcast %cst_5 : f32 to vector<256x256xf32>
    %8 = arith.maximumf %6, %7 : vector<256x256xf32>
    %9 = arith.truncf %8 : vector<256x256xf32> to vector<256x256xbf16>
    %c0_6 = arith.constant 0 : index
    %c0_7 = arith.constant 0 : index
    %10 = vector.load %arg4[%c0_6, %c0_7] : memref<256x256xbf16, #tpu.memory_space<vmem>>, vector<256x256xbf16>
    %cst_8 = arith.constant dense<0.000000e+00> : vector<256x256xf32>
    %11 = tpu.matmul %9, %10, %cst_8 {dimension_numbers = #tpu.dot_dimension_numbers<[1], [0], [0], [1], [0, 0, 1, 1], [], []>} : vector<256x256xbf16>, vector<256x256xbf16>, vector<256x256xf32> -> vector<256x256xf32>
    %c0_9 = arith.constant 0 : index
    %c0_10 = arith.constant 0 : index
    %12 = vector.load %arg5[%c0_9, %c0_10] : memref<1x256xf32, #tpu.memory_space<vmem>>, vector<1x256xf32>
    %13 = vector.broadcast %12 : vector<1x256xf32> to vector<256x256xf32>
    %14 = arith.addf %11, %13 : vector<256x256xf32>
    %cst_11 = arith.constant 0.000000e+00 : f32
    %15 = vector.broadcast %cst_11 : f32 to vector<256x256xf32>
    %16 = arith.maximumf %14, %15 : vector<256x256xf32>
    %17 = arith.truncf %16 : vector<256x256xf32> to vector<256x256xbf16>
    %c0_12 = arith.constant 0 : index
    %c0_13 = arith.constant 0 : index
    %18 = vector.load %arg6[%c0_12, %c0_13] : memref<256x256xbf16, #tpu.memory_space<vmem>>, vector<256x256xbf16>
    %cst_14 = arith.constant dense<0.000000e+00> : vector<256x256xf32>
    %19 = tpu.matmul %17, %18, %cst_14 {dimension_numbers = #tpu.dot_dimension_numbers<[1], [0], [0], [1], [0, 0, 1, 1], [], []>} : vector<256x256xbf16>, vector<256x256xbf16>, vector<256x256xf32> -> vector<256x256xf32>
    %c0_15 = arith.constant 0 : index
    %c0_16 = arith.constant 0 : index
    %20 = vector.load %arg7[%c0_15, %c0_16] : memref<1x256xf32, #tpu.memory_space<vmem>>, vector<1x256xf32>
    %21 = vector.broadcast %20 : vector<1x256xf32> to vector<256x256xf32>
    %22 = arith.addf %19, %21 : vector<256x256xf32>
    %cst_17 = arith.constant 0.000000e+00 : f32
    %23 = vector.broadcast %cst_17 : f32 to vector<256x256xf32>
    %24 = arith.maximumf %22, %23 : vector<256x256xf32>
    %25 = arith.truncf %24 : vector<256x256xf32> to vector<256x256xbf16>
    %c0_18 = arith.constant 0 : index
    %c0_19 = arith.constant 0 : index
    %26 = vector.load %arg8[%c0_18, %c0_19] : memref<256x128xbf16, #tpu.memory_space<vmem>>, vector<256x128xbf16>
    %cst_20 = arith.constant dense<0.000000e+00> : vector<256x128xf32>
    %27 = tpu.matmul %25, %26, %cst_20 {dimension_numbers = #tpu.dot_dimension_numbers<[1], [0], [0], [1], [0, 0, 1, 1], [], []>} : vector<256x256xbf16>, vector<256x128xbf16>, vector<256x128xf32> -> vector<256x128xf32>
    %c0_21 = arith.constant 0 : index
    %c0_22 = arith.constant 0 : index
    %28 = vector.load %arg9[%c0_21, %c0_22] : memref<1x128xf32, #tpu.memory_space<vmem>>, vector<1x128xf32>
    %29 = vector.broadcast %28 : vector<1x128xf32> to vector<256x128xf32>
    %30 = arith.addf %27, %29 : vector<256x128xf32>
    %31 = math.tanh %30 : vector<256x128xf32>
    %cst_23 = arith.constant 1.000000e+00 : f32
    %32 = vector.broadcast %cst_23 : f32 to vector<256x128xf32>
    %33 = arith.mulf %32, %31 : vector<256x128xf32>
    %c0_24 = arith.constant 0 : index
    %c0_25 = arith.constant 0 : index
    %34 = vector.load %arg10[%c0_24, %c0_25] : memref<256x128xf32, #tpu.memory_space<vmem>>, vector<256x128xf32>
    tpu.vector_store %arg10[%c0_24, %c0_25], %33 {strides = array<i32>} : memref<256x128xf32, #tpu.memory_space<vmem>>, vector<256x128xf32>,
    return
  }
  func.func @transform_0(%arg0: i32) -> (i32, i32) {
    %c0_i32 = arith.constant 0 : i32
    %c0_i32_0 = arith.constant 0 : i32
    return %arg0, %c0_i32 : i32, i32
  }
  func.func @transform_1(%arg0: i32) -> (i32, i32) {
    %c0_i32 = arith.constant 0 : i32
    %c0_i32_0 = arith.constant 0 : i32
    %c0_i32_1 = arith.constant 0 : i32
    return %c0_i32, %c0_i32_0 : i32, i32
  }
  func.func @transform_2(%arg0: i32) -> (i32, i32) {
    %c0_i32 = arith.constant 0 : i32
    %c0_i32_0 = arith.constant 0 : i32
    %c0_i32_1 = arith.constant 0 : i32
    return %c0_i32, %c0_i32_0 : i32, i32
  }
  func.func @transform_3(%arg0: i32) -> (i32, i32) {
    %c0_i32 = arith.constant 0 : i32
    %c0_i32_0 = arith.constant 0 : i32
    %c0_i32_1 = arith.constant 0 : i32
    return %c0_i32, %c0_i32_0 : i32, i32
  }
  func.func @transform_4(%arg0: i32) -> (i32, i32) {
    %c0_i32 = arith.constant 0 : i32
    %c0_i32_0 = arith.constant 0 : i32
    %c0_i32_1 = arith.constant 0 : i32
    return %c0_i32, %c0_i32_0 : i32, i32
  }
  func.func @transform_5(%arg0: i32) -> (i32, i32) {
    %c0_i32 = arith.constant 0 : i32
    %c0_i32_0 = arith.constant 0 : i32
    %c0_i32_1 = arith.constant 0 : i32
    return %c0_i32, %c0_i32_0 : i32, i32
  }
  func.func @transform_6(%arg0: i32) -> (i32, i32) {
    %c0_i32 = arith.constant 0 : i32
    %c0_i32_0 = arith.constant 0 : i32
    %c0_i32_1 = arith.constant 0 : i32
    return %c0_i32, %c0_i32_0 : i32, i32
  }
  func.func @transform_7(%arg0: i32) -> (i32, i32) {
    %c0_i32 = arith.constant 0 : i32
    %c0_i32_0 = arith.constant 0 : i32
    %c0_i32_1 = arith.constant 0 : i32
    return %c0_i32, %c0_i32_0 : i32, i32
  }
  func.func @transform_8(%arg0: i32) -> (i32, i32) {
    %c0_i32 = arith.constant 0 : i32
    %c0_i32_0 = arith.constant 0 : i32
    %c0_i32_1 = arith.constant 0 : i32
    return %c0_i32, %c0_i32_0 : i32, i32
  }
  func.func @transform_9(%arg0: i32) -> (i32, i32) {
    %c0_i32 = arith.constant 0 : i32
    %c0_i32_0 = arith.constant 0 : i32
    return %arg0, %c0_i32 : i32, i32
  }
}

</mosaic_0001>

<bundles_post_ra>
// kernel: tpu_custom_call.1
= control target key start
LH: loop header
LB: loop body
LE: loop exit
PB: predicated region body
PF: predicated region fallthrough
CT: control target
= control target key end

     0   :  { %14 = vsyncpa [#allocation3], 0  ;;  %s2922_s0 = inlined_call_operand.vmem [shape: f32[256,13], index: 0, kind: input, shape index: {}]   ;;  %s2923_s1 = inlined_call_operand.vmem [shape: bf16[13,256], index: 1, kind: input, shape index: {}]   ;;  %s2924_s2 = inlined_call_operand.vmem [shape: f32[1,256], index: 2, kind: input, shape index: {}]   ;;  %s2925_s3 = inlined_call_operand.vmem [shape: bf16[256,256], index: 3, kind: input, shape index: {}]   ;;  %s2926_s4 = inlined_call_operand.vmem [shape: f32[1,256], index: 4, kind: input, shape index: {}]   ;;  %s2927_s5 = inlined_call_operand.hbm [shape: bf16[256,256], index: 5, kind: input, shape index: {}]   ;;  %s2928_s6 = inlined_call_operand.vmem [shape: f32[1,256], index: 6, kind: input, shape index: {}]   ;;  %s2929_s7 = inlined_call_operand.hbm [shape: bf16[256,128], index: 7, kind: input, shape index: {}]   ;;  %s2930_s8 = inlined_call_operand.vmem [shape: f32[1,128], index: 8, kind: input, shape index: {}]   ;;  %s2931_s9 = inlined_call_operand.hbm [shape: f32[256,128], index: 9, kind: output, shape index: {}]  }
   0x1   :  { %15 = vsyncpa [#allocation6], 0 }
   0x2   :  { %16 = vsyncpa [#allocation4], 0  ;;  %s2331_s30 = smov [#allocation2]   ;;  %s2259_s13 = scalar_lea.hbm %s2927_s5, 4096 }
   0x3   :  { %s32_s10 = sshll.u32 %s2331_s30, 4  ;;  %p2260_p0 = scmp.ne.s32.totalorder %s2927_s5, %s2259_s13  ;;  %s33_s10 = int_to_ptr.vmem [resolvable:$true] %s32_s10 }
   0x4   :  { %p2263_p1 = scmp.lt.u32.totalorder %s2259_s13, %s2927_s5 }
   0x6   :  { %p2265_p2 = pnand %p2263_p1, %p2260_p0 }
   0x8   :  { %2268 = shalt.err (!%p2265_p2)
}
   0x9   :  { %s2269_s18 = scalar_lea.vmem %s33_s10, 4096  ;;  %p2274_p4 = scmp.lt.s32.totalorder %s33_s10, %s33_s10 }
   0xa   :  { %p2270_p3 = scmp.ne.s32.totalorder %s33_s10, %s2269_s18  ;;  %p2275_p5 = scmp.lt.s32.totalorder %s2269_s18, %s2269_s18 }
   0xc   :  { %p2276_p6 = por %p2275_p5, %p2274_p4 }
   0xe   :  { %p2277_p7 = pnand %p2276_p6, %p2270_p3 }
  0x10   :  { %2280 = shalt.err (!%p2277_p7)
}
  0x11   :  { %s2332_s19 = smov 128   ;;  %s2333_s20 = smov 8  }
  0x12   :  { %38 = dma.hbm_to_vmem [thread:$0]  %s2927_s5, 4096, %s33_s10, [#allocation3], %s2332_s19, %s2332_s19, %s2333_s20  }
  0x13   :  { %s2334_s23 = smov [#allocation5]   ;;  %s2281_s27 = scalar_lea.hbm %s2929_s7, 2048 }
  0x14   :  { %s46_s24 = sshll.u32 %s2334_s23, 4  ;;  %p2282_p8 = scmp.ne.s32.totalorder %s2929_s7, %s2281_s27  ;;  %s47_s24 = int_to_ptr.vmem [resolvable:$true] %s46_s24 }
  0x15   :  { %p2285_p9 = scmp.lt.u32.totalorder %s2281_s27, %s2929_s7 }
  0x17   :  { %p2287_p10 = pnand %p2285_p9, %p2282_p8 }
  0x19   :  { %2290 = shalt.err (!%p2287_p10)
}
  0x1a   :  { %s2291_s12 = scalar_lea.vmem %s47_s24, 2048  ;;  %p2296_p12 = scmp.lt.s32.totalorder %s47_s24, %s47_s24 }
  0x1b   :  { %p2292_p11 = scmp.ne.s32.totalorder %s47_s24, %s2291_s12  ;;  %p2297_p13 = scmp.lt.s32.totalorder %s2291_s12, %s2291_s12 }
  0x1d   :  { %p2298_p0 = por %p2297_p13, %p2296_p12 }
  0x1f   :  { %p2299_p1 = pnand %p2298_p0, %p2292_p11 }
  0x21   :  { %2302 = shalt.err (!%p2299_p1)
}
  0x22   :  { %s2335_s5 = smov 64   ;;  %s2336_s10 = smov 4  }
  0x23   :  { %52 = dma.hbm_to_vmem [thread:$0]  %s2929_s7, 2048, %s47_s24, [#allocation6], %s2335_s5, %s2335_s5, %s2336_s10  }
  0x24   :  { %2325 = dma.done.wait [#allocation3], 4096  }
  0x25   :  { %2326 = vsyncadd [#allocation3], 4294963200 }
  0x26   :  { %2327 = dma.done.wait [#allocation6], 2048  }
  0x27   :  { %2328 = vsyncadd [#allocation6], 4294965248  ;;  %vm181_vm0 = vcmask 1045504   ;;  %v2337_v0 = vmov 0   ;;  %vm182_vm1 = vcmask 1046528   ;;  %v2338_v1 = vmov 65535  }
  0x28   :  { %223 = vmatprep.mubr.bf16.mxu0 %v2337_v0  ;;  %v183_v2 = vsel %vm181_vm0, 4294967295, %v2338_v1  ;;  %v2080_v4 = vld [vmem:[%s2923_s1 + $0x4] ss:$8 sps:$4 sm:$0x7f]   ;;  %vm132_vm2 = vcmask 105472   ;;  %v64_v11 = vld [vmem:[%s2922_s0 + $0x10] sm:$0xff] }
  0x29   :  { %v184_v3 = vsel %vm182_vm1, %v183_v2, 0  ;;  %v2082_v5 = vld [vmem:[%s2923_s1] ss:$8 sps:$4 sm:$0x7f]   ;;  %v65_v12 = vld [vmem:[%s2922_s0 + $0x18] sm:$0xff]  ;;  %v68_v24 = vld [vmem:[%s2922_s0 + $0x30] sm:$0xff] }
  0x2a   :  { %v62_v6 = vld [vmem:[%s2922_s0] sm:$0xff]  ;;  %v63_v7 = vld [vmem:[%s2922_s0 + $0x8] sm:$0xff]  ;;  %v189_v8 = vand.u32 %v2080_v4, %v184_v3  ;;  %v186_v9 = vand.u32 %v2082_v5, %v184_v3  ;;  %v95_v13 = vpack.c.bf16 %v65_v12, %v64_v11  ;;  %v2086_v16 = vld [vmem:[%s2925_s3 + $0x14] ss:$8 sps:$4 sm:$0xff]  }
  0x2b   :  { %v94_v10 = vpack.c.bf16 %v63_v7, %v62_v6  ;;  %v2083_v14 = vld [vmem:[%s2925_s3 + $0x4] ss:$8 sps:$4 sm:$0xff]   ;;  %v2085_v15 = vld [vmem:[%s2925_s3] ss:$8 sps:$4 sm:$0xff]   ;;  %v2088_v18 = vld [vmem:[%s2925_s3 + $0x10] ss:$8 sps:$4 sm:$0xff]  }
  0x2c   :  { %191 = vmatprep.subr.bf16.mxu0 %v189_v8  ;;  %684 = vmatprep.subr.bf16.mxu1 %v2083_v14  ;;  %v66_v17 = vld [vmem:[%s2922_s0 + $0x20] sm:$0xff]  ;;  %v67_v20 = vld [vmem:[%s2922_s0 + $0x28] sm:$0xff]  ;;  %v2092_v23 = vld [vmem:[%s2925_s3 + $0x34] ss:$8 sps:$4 sm:$0xff]  }
  0x2d   :  { %192 = vmatpush1.bf16.msra.mxu0 %v186_v9  ;;  %685 = vmatpush1.bf16.msra.mxu1 %v2085_v15  ;;  %v2089_v19 = vld [vmem:[%s2925_s3 + $0x24] ss:$8 sps:$4 sm:$0xff]   ;;  %v2091_v21 = vld [vmem:[%s2925_s3 + $0x20] ss:$8 sps:$4 sm:$0xff]   ;;  %v96_v22 = vpack.c.bf16 %v67_v20, %v66_v17  ;;  %v2094_v25 = vld [vmem:[%s2925_s3 + $0x30] ss:$8 sps:$4 sm:$0xff]  }
  0x2e   :  { %686 = vmatprep.subr.bf16.mxu1 %v2086_v16  ;;  %v2095_v26 = vld [vmem:[%s2925_s3 + $0x44] ss:$8 sps:$4 sm:$0xff]   ;;  %v69_v27 = vld [vmem:[%s2922_s0 + $0x38] sm:$0xff]  ;;  %v2097_v28 = vld [vmem:[%s2925_s3 + $0x40] ss:$8 sps:$4 sm:$0xff]  }
  0x2f   :  { %v97_v29 = vpack.c.bf16 %v69_v27, %v68_v24  ;;  %v2098_v30 = vld [vmem:[%s2925_s3 + $0x54] ss:$8 sps:$4 sm:$0xff]   ;;  %v2100_v31 = vld [vmem:[%s2925_s3 + $0x50] ss:$8 sps:$4 sm:$0xff]   ;;  %v2101_v32 = vld [vmem:[%s2925_s3 + $0x64] ss:$8 sps:$4 sm:$0xff]   ;;  %v114_v27 = vlaneseq }
  0x30   :  { %1846 = vmatmul.mubr.msk.bf16.vlgmr.msra.gmra.mrb[0].mxu0 %vm132_vm2, %v94_v10  ;;  %v70_v33 = vld [vmem:[%s2922_s0 + $0x40] sm:$0xff]  ;;  %v71_v34 = vld [vmem:[%s2922_s0 + $0x48] sm:$0xff]  ;;  %v2104_v36 = vld [vmem:[%s2925_s3 + $0x74] ss:$8 sps:$4 sm:$0xff]  }
  0x31   :  { %233 = vmatprep.mubr.bf16.mxu0 %v2337_v0  ;;  %687 = vmatpush1.bf16.msra.mxu1 %v2088_v18  ;;  %v2103_v35 = vld [vmem:[%s2925_s3 + $0x60] ss:$8 sps:$4 sm:$0xff]   ;;  %v98_v37 = vpack.c.bf16 %v71_v34, %v70_v33  ;;  %v2106_v38 = vld [vmem:[%s2925_s3 + $0x70] ss:$8 sps:$4 sm:$0xff]   ;;  %v2107_v39 = vld [vmem:[%s2925_s3 + $0x84] ss:$8 sps:$4 sm:$0xff]  }
  0x32   :  { %688 = vmatprep.subr.bf16.mxu1 %v2089_v19  ;;  %v72_v40 = vld [vmem:[%s2922_s0 + $0x50] sm:$0xff]  ;;  %v73_v41 = vld [vmem:[%s2922_s0 + $0x58] sm:$0xff]  ;;  %v2109_v42 = vld [vmem:[%s2925_s3 + $0x80] ss:$8 sps:$4 sm:$0xff]  }
  0x33   :  { %v2110_v43 = vld [vmem:[%s2925_s3 + $0x94] ss:$8 sps:$4 sm:$0xff]   ;;  %v99_v44 = vpack.c.bf16 %v73_v41, %v72_v40  ;;  %v2112_v45 = vld [vmem:[%s2925_s3 + $0x90] ss:$8 sps:$4 sm:$0xff]   ;;  %v2113_v46 = vld [vmem:[%s2925_s3 + $0xa4] ss:$8 sps:$4 sm:$0xff]  }
  0x34   :  { %v74_v47 = vld [vmem:[%s2922_s0 + $0x60] sm:$0xff]  ;;  %v75_v48 = vld [vmem:[%s2922_s0 + $0x68] sm:$0xff]  ;;  %v2116_v50 = vld [vmem:[%s2925_s3 + $0xb4] ss:$8 sps:$4 sm:$0xff]  }
  0x35   :  { %689 = vmatpush1.bf16.msra.mxu1 %v2091_v21  ;;  %v2115_v49 = vld [vmem:[%s2925_s3 + $0xa0] ss:$8 sps:$4 sm:$0xff]   ;;  %v100_v51 = vpack.c.bf16 %v75_v48, %v74_v47  ;;  %v2118_v52 = vld [vmem:[%s2925_s3 + $0xb0] ss:$8 sps:$4 sm:$0xff]   ;;  %v2119_v53 = vld [vmem:[%s2925_s3 + $0xc4] ss:$8 sps:$4 sm:$0xff]  }
  0x36   :  { %690 = vmatprep.subr.bf16.mxu1 %v2092_v23  ;;  %v76_v54 = vld [vmem:[%s2922_s0 + $0x70] sm:$0xff]  ;;  %v77_v55 = vld [vmem:[%s2922_s0 + $0x78] sm:$0xff]  ;;  %v2121_v56 = vld [vmem:[%s2925_s3 + $0xc0] ss:$8 sps:$4 sm:$0xff]  }
  0x37   :  { %v101_v57 = vpack.c.bf16 %v77_v55, %v76_v54  ;;  %v2122_v58 = vld [vmem:[%s2925_s3 + $0xd4] ss:$8 sps:$4 sm:$0xff]   ;;  %v78_v59 = vld [vmem:[%s2922_s0 + $0x80] sm:$0xff]  ;;  %v79_v60 = vld [vmem:[%s2922_s0 + $0x88] sm:$0xff] }
  0x38   :  { %1847 = vmatmul.mubr.msk.bf16.gmra.mrb[4].mxu0 %vm132_vm2, %v95_v13  ;;  %v102_v61 = vpack.c.bf16 %v79_v60, %v78_v59  ;;  %v80_v62 = vld [vmem:[%s2922_s0 + $0x90] sm:$0xff]  ;;  %v81_v63 = vld [vmem:[%s2922_s0 + $0x98] sm:$0xff]  ;;  %v82_v2 = vld [vmem:[%s2922_s0 + $0xa0] sm:$0xff] }
  0x39   :  { %243 = vmatprep.mubr.bf16.mxu0 %v2337_v0  ;;  %691 = vmatpush1.bf16.msra.mxu1 %v2094_v25  ;;  %v103_v1 = vpack.c.bf16 %v81_v63, %v80_v62  ;;  %v83_v3 = vld [vmem:[%s2922_s0 + $0xa8] sm:$0xff]  ;;  %v84_v5 = vld [vmem:[%s2922_s0 + $0xb0] sm:$0xff]  ;;  %v85_v6 = vld [vmem:[%s2922_s0 + $0xb8] sm:$0xff] }
  0x3a   :  { %692 = vmatprep.subr.bf16.mxu1 %v2095_v26  ;;  %v104_v4 = vpack.c.bf16 %v83_v3, %v82_v2  ;;  %v2124_v7 = vld [vmem:[%s2925_s3 + $0xd0] ss:$8 sps:$4 sm:$0xff]   ;;  %v105_v8 = vpack.c.bf16 %v85_v6, %v84_v5  ;;  %v2125_v9 = vld [vmem:[%s2925_s3 + $0xe4] ss:$8 sps:$4 sm:$0xff]   ;;  %v2127_v10 = vld [vmem:[%s2925_s3 + $0xe0] ss:$8 sps:$4 sm:$0xff]  }
  0x3b   :  { %v2128_v11 = vld [vmem:[%s2925_s3 + $0xf4] ss:$8 sps:$4 sm:$0xff]   ;;  %v86_v12 = vld [vmem:[%s2922_s0 + $0xc0] sm:$0xff]  ;;  %v87_v13 = vld [vmem:[%s2922_s0 + $0xc8] sm:$0xff] }
  0x3c   :  { %v2130_v14 = vld [vmem:[%s2925_s3 + $0xf0] ss:$8 sps:$4 sm:$0xff]   ;;  %v106_v15 = vpack.c.bf16 %v87_v13, %v86_v12  ;;  %v90_v19 = vld [vmem:[%s2922_s0 + $0xe0] sm:$0xff]  ;;  %v91_v20 = vld [vmem:[%s2922_s0 + $0xe8] sm:$0xff] }
  0x3d   :  { %693 = vmatpush1.bf16.msra.mxu1 %v2097_v28  ;;  %v88_v16 = vld [vmem:[%s2922_s0 + $0xd0] sm:$0xff]  ;;  %v89_v17 = vld [vmem:[%s2922_s0 + $0xd8] sm:$0xff]  ;;  %v108_v21 = vpack.c.bf16 %v91_v20, %v90_v19  ;;  %v2131_v25 = vld [vmem:[#allocation2] ss:$8 sps:$4 sm:$0xff]  }
  0x3e   :  { %694 = vmatprep.subr.bf16.mxu1 %v2098_v30  ;;  %v107_v18 = vpack.c.bf16 %v89_v17, %v88_v16  ;;  %v93_v23 = vld [vmem:[%s2922_s0 + $0xf8] sm:$0xff]  ;;  %v2133_v26 = vld [vmem:[#allocation2 + $0x4] ss:$8 sps:$4 sm:$0xff]   ;;  %v115_v30 = vshrl.u32 %v114_v27, 7  ;;  %v2137_v33 = vld [vmem:[#allocation2 + $0x20] ss:$8 sps:$4 sm:$0xff]  }
  0x3f   :  { %1177 = vmatprep.subr.bf16.mxu0 %v2133_v26  ;;  %v2134_v28 = vld [vmem:[#allocation2 + $0x10] ss:$8 sps:$4 sm:$0xff]   ;;  %v2139_v34 = vld [vmem:[#allocation2 + $0x24] ss:$8 sps:$4 sm:$0xff]   ;;  %v2149_v2 = vld [vmem:[#allocation2 + $0x60] ss:$8 sps:$4 sm:$0xff]  }
  0x40   :  { %1848 = vmatmul.mubr.msk.bf16.gmra.mrb[8].mxu0 %vm132_vm2, %v96_v22  ;;  %v92_v22 = vld [vmem:[%s2922_s0 + $0xf0] sm:$0xff]  ;;  %v2145_v47 = vld [vmem:[#allocation2 + $0x44] ss:$8 sps:$4 sm:$0xff]   ;;  %v2155_v20 = vld [vmem:[#allocation2 + $0x80] ss:$8 sps:$4 sm:$0xff]  }
  0x41   :  { %253 = vmatprep.mubr.bf16.mxu0 %v2337_v0  ;;  %695 = vmatpush1.bf16.msra.mxu1 %v2100_v31  ;;  %v109_v24 = vpack.c.bf16 %v93_v23, %v92_v22  ;;  %v112_v31 = vld [vmem:[%s2924_s2] sm:$0x3]  ;;  %v2146_v55 = vld [vmem:[#allocation2 + $0x50] ss:$8 sps:$4 sm:$0xff]   ;;  %v2157_v13 = vld [vmem:[#allocation2 + $0x84] ss:$8 sps:$4 sm:$0xff]  }
  0x42   :  { %696 = vmatprep.subr.bf16.mxu1 %v2101_v32  ;;  %1178 = vmatpush1.bf16.msra.mxu0 %v2131_v25  ;;  %v2652_v32 = vsub.s32 1, %v115_v30  ;;  %v2160_v22 = vld [vmem:[#allocation2 + $0x94] ss:$8 sps:$4 sm:$0xff]  }
  0x45   :  { %697 = vmatpush1.bf16.msra.mxu1 %v2103_v35 }
  0x46   :  { %698 = vmatprep.subr.bf16.mxu1 %v2104_v36  ;;  %v2658_v36 = vrot.slane %v112_v31, %v2652_v32 }
  0x48   :  { %1849 = vmatmul.mubr.msk.bf16.gmra.mrb[12].mxu0 %vm132_vm2, %v97_v29  ;;  %v2136_v29 = vld [vmem:[#allocation2 + $0x14] ss:$8 sps:$4 sm:$0xff]  }
  0x49   :  { %263 = vmatprep.mubr.bf16.mxu0 %v2337_v0  ;;  %699 = vmatpush1.bf16.msra.mxu1 %v2106_v38  ;;  %v2140_v38 = vld [vmem:[#allocation2 + $0x30] ss:$8 sps:$4 sm:$0xff]  }
  0x4a   :  { %700 = vmatprep.subr.bf16.mxu1 %v2107_v39  ;;  %1179 = vmatprep.subr.bf16.mxu0 %v2136_v29  ;;  %v2142_v39 = vld [vmem:[#allocation2 + $0x34] ss:$8 sps:$4 sm:$0xff]  }
  0x4b   :  { %1180 = vmatpush1.bf16.msra.mxu0 %v2134_v28  ;;  %v2158_v28 = vld [vmem:[#allocation2 + $0x90] ss:$8 sps:$4 sm:$0xff]  }
  0x4c   :  { %1181 = vmatprep.subr.bf16.mxu0 %v2139_v34 }
  0x4d   :  { %701 = vmatpush1.bf16.msra.mxu1 %v2109_v42 }
  0x4e   :  { %702 = vmatprep.subr.bf16.mxu1 %v2110_v43 }
  0x4f   :  { %1182 = vmatpush1.bf16.msra.mxu0 %v2137_v33 }
  0x50   :  { %1850 = vmatmul.mubr.msk.bf16.gmra.mrb[16].mxu0 %vm132_vm2, %v98_v37  ;;  %1183 = vmatprep.subr.bf16.mxu0 %v2142_v39 }
  0x51   :  { %273 = vmatprep.mubr.bf16.mxu0 %v2337_v0  ;;  %703 = vmatpush1.bf16.msra.mxu1 %v2112_v45 }
  0x52   :  { %704 = vmatprep.subr.bf16.mxu1 %v2113_v46  ;;  %v2143_v46 = vld [vmem:[#allocation2 + $0x40] ss:$8 sps:$4 sm:$0xff]  }
  0x53   :  { %1184 = vmatpush1.bf16.msra.mxu0 %v2140_v38 }
  0x54   :  { %1185 = vmatprep.subr.bf16.mxu0 %v2145_v47 }
  0x55   :  { %705 = vmatpush1.bf16.msra.mxu1 %v2115_v49  ;;  %v2148_v49 = vld [vmem:[#allocation2 + $0x54] ss:$8 sps:$4 sm:$0xff]  }
  0x56   :  { %706 = vmatprep.subr.bf16.mxu1 %v2116_v50 }
  0x57   :  { %1186 = vmatpush1.bf16.msra.mxu0 %v2143_v46 }
  0x58   :  { %1851 = vmatmul.mubr.msk.bf16.gmra.mrb[20].mxu0 %vm132_vm2, %v99_v44  ;;  %1187 = vmatprep.subr.bf16.mxu0 %v2148_v49  ;;  %v2164_v49 = vld [vmem:[#allocation2 + $0xb0] ss:$8 sps:$4 sm:$0xff]  }
  0x59   :  { %283 = vmatprep.mubr.bf16.mxu0 %v2337_v0  ;;  %707 = vmatpush1.bf16.msra.mxu1 %v2118_v52 }
  0x5a   :  { %708 = vmatprep.subr.bf16.mxu1 %v2119_v53 }
  0x5b   :  { %1188 = vmatpush1.bf16.msra.mxu0 %v2146_v55 }
  0x5d   :  { %709 = vmatpush1.bf16.msra.mxu1 %v2121_v56 }
  0x5e   :  { %710 = vmatprep.subr.bf16.mxu1 %v2122_v58  ;;  %v2151_v58 = vld [vmem:[#allocation2 + $0x64] ss:$8 sps:$4 sm:$0xff]  }
  0x5f   :  { %1189 = vmatprep.subr.bf16.mxu0 %v2151_v58 }
  0x60   :  { %1852 = vmatmul.mubr.msk.bf16.gmra.mrb[24].mxu0 %vm132_vm2, %v100_v51 }
  0x61   :  { %293 = vmatprep.mubr.bf16.mxu0 %v2337_v0  ;;  %711 = vmatpush1.bf16.msra.mxu1 %v2124_v7 }
  0x62   :  { %712 = vmatprep.subr.bf16.mxu1 %v2125_v9  ;;  %1190 = vmatpush1.bf16.msra.mxu0 %v2149_v2 }
  0x65   :  { %713 = vmatpush1.bf16.msra.mxu1 %v2127_v10  ;;  %v2152_v10 = vld [vmem:[#allocation2 + $0x70] ss:$8 sps:$4 sm:$0xff]  }
  0x66   :  { %714 = vmatprep.subr.bf16.mxu1 %v2128_v11 }
  0x68   :  { %1853 = vmatmul.mubr.msk.bf16.gmra.mrb[28].mxu0 %vm132_vm2, %v101_v57 }
  0x69   :  { %303 = vmatprep.mubr.bf16.mxu0 %v2337_v0  ;;  %715 = vmatpush1.bf16.msra.mxu1 %v2130_v14 }
  0x70   :  { %1854 = vmatmul.mubr.msk.bf16.gmra.mrb[32].mxu0 %vm132_vm2, %v102_v61 }
  0x71   :  { %313 = vmatprep.mubr.bf16.mxu0 %v2337_v0 }
  0x78   :  { %1855 = vmatmul.mubr.msk.bf16.gmra.mrb[36].mxu0 %vm132_vm2, %v103_v1 }
  0x79   :  { %323 = vmatprep.mubr.bf16.mxu0 %v2337_v0 }
  0x80   :  { %1856 = vmatmul.mubr.msk.bf16.gmra.mrb[40].mxu0 %vm132_vm2, %v104_v4  ;;  %v2154_v4 = vld [vmem:[#allocation2 + $0x74] ss:$8 sps:$4 sm:$0xff]  }
  0x81   :  { %333 = vmatprep.mubr.bf16.mxu0 %v2337_v0  ;;  %1191 = vmatprep.subr.bf16.mxu0 %v2154_v4  ;;  %v2170_v4 = vld [vmem:[#allocation2 + $0xd0] ss:$8 sps:$4 sm:$0xff]  }
  0x82   :  { %1192 = vmatpush1.bf16.msra.mxu0 %v2152_v10 }
  0x83   :  { %1193 = vmatprep.subr.bf16.mxu0 %v2157_v13 }
  0x86   :  { %1194 = vmatpush1.bf16.msra.mxu0 %v2155_v20 }
  0x87   :  { %1195 = vmatprep.subr.bf16.mxu0 %v2160_v22 }
  0x88   :  { %1857 = vmatmul.mubr.msk.bf16.gmra.mrb[44].mxu0 %vm132_vm2, %v105_v8 }
  0x89   :  { %343 = vmatprep.mubr.bf16.mxu0 %v2337_v0 }
  0x8a   :  { %1196 = vmatpush1.bf16.msra.mxu0 %v2158_v28 }
  0x90   :  { %1858 = vmatmul.mubr.msk.bf16.gmra.mrb[48].mxu0 %vm132_vm2, %v106_v15 }
  0x91   :  { %353 = vmatprep.mubr.bf16.mxu0 %v2337_v0 }
  0x98   :  { %1859 = vmatmul.mubr.msk.bf16.gmra.mrb[52].mxu0 %vm132_vm2, %v107_v18 }
  0x99   :  { %363 = vmatprep.mubr.bf16.mxu0 %v2337_v0 }
  0xa0   :  { %1860 = vmatmul.mubr.msk.bf16.gmra.mrb[56].mxu0 %vm132_vm2, %v108_v21 }
  0xa1   :  { %373 = vmatprep.mubr.bf16.mxu0 %v2337_v0  ;;  %v2647_v0 = vsub.s32 0, %v115_v30 }
  0xa3   :  { %v2655_v35 = vrot.slane %v112_v31, %v2647_v0  ;;  %v2163_v31 = vld [vmem:[#allocation2 + $0xa4] ss:$8 sps:$4 sm:$0xff]  }
  0xa4   :  { %1197 = vmatprep.subr.bf16.mxu0 %v2163_v31 }
  0xa8   :  { %1861 = vmatmul.mubr.msk.bf16.gmra.mrb[60].mxu0 %vm132_vm2, %v109_v24 }
 0x103   :  { %v225_v37 = vpop.f32.mrb[0].mxu0 }
 0x104   :  { %v226_v40 = vadd.f32 %v225_v37, %v2655_v35  ;;  %v227_v41 = vpop.f32.mrb[1].mxu0 }
 0x105   :  { %v228_v42 = vadd.f32 %v227_v41, %v2658_v36  ;;  %v229_v43 = vpop.f32.mrb[2].mxu0  ;;  %v2161_v41 = vld [vmem:[#allocation2 + $0xa0] ss:$8 sps:$4 sm:$0xff]  }
 0x106   :  { %v230_v44 = vadd.f32 %v229_v43, %v2655_v35  ;;  %v231_v45 = vpop.f32.mrb[3].mxu0  ;;  %v384_v50 = vmax.f32 %v226_v40, 0.0  ;;  %v2166_v43 = vld [vmem:[#allocation2 + $0xb4] ss:$8 sps:$4 sm:$0xff]   ;;  %1198 = vmatpush1.bf16.msra.mxu0 %v2161_v41 }
 0x107   :  { %v232_v48 = vadd.f32 %v231_v45, %v2658_v36  ;;  %v385_v52 = vmax.f32 %v228_v42, 0.0  ;;  %1199 = vmatprep.subr.bf16.mxu0 %v2166_v43 }
 0x108   :  { %v386_v51 = vmax.f32 %v230_v44, 0.0 }
 0x109   :  { %v387_v53 = vmax.f32 %v232_v48, 0.0 }
 0x10a   :  { %v448_v54 = vpack.c.bf16 %v386_v51, %v384_v50  ;;  %1200 = vmatpush1.bf16.msra.mxu0 %v2164_v49 }
 0x10b   :  { %v235_v56 = vpop.f32.mrb[4].mxu0  ;;  %v449_v57 = vpack.c.bf16 %v387_v53, %v385_v52  ;;  %v2169_v52 = vld [vmem:[#allocation2 + $0xc4] ss:$8 sps:$4 sm:$0xff]  }
 0x10c   :  { %v236_v59 = vadd.f32 %v235_v56, %v2655_v35  ;;  %v237_v60 = vpop.f32.mrb[5].mxu0  ;;  %1201 = vmatprep.subr.bf16.mxu0 %v2169_v52 }
 0x10d   :  { %v238_v61 = vadd.f32 %v237_v60, %v2658_v36  ;;  %v239_v62 = vpop.f32.mrb[6].mxu0  ;;  %716 = vmatprep.mubr.bf16.mxu1 %v449_v57 }
 0x10e   :  { %v240_v63 = vadd.f32 %v239_v62, %v2655_v35  ;;  %v241_v1 = vpop.f32.mrb[7].mxu0  ;;  %717 = vmatmul.mubr.bf16.vlgmr.msra.gmra.mrb[0].mxu1 %v448_v54  ;;  %v388_v5 = vmax.f32 %v236_v59, 0.0  ;;  %v2167_v59 = vld [vmem:[#allocation2 + $0xc0] ss:$8 sps:$4 sm:$0xff]  }
 0x10f   :  { %v242_v3 = vadd.f32 %v241_v1, %v2658_v36  ;;  %v389_v7 = vmax.f32 %v238_v61, 0.0  ;;  %v2172_v61 = vld [vmem:[#allocation2 + $0xd4] ss:$8 sps:$4 sm:$0xff]   ;;  %1202 = vmatpush1.bf16.msra.mxu0 %v2167_v59 }
 0x110   :  { %v390_v6 = vmax.f32 %v240_v63, 0.0  ;;  %1203 = vmatprep.subr.bf16.mxu0 %v2172_v61 }
 0x111   :  { %v391_v8 = vmax.f32 %v242_v3, 0.0 }
 0x112   :  { %v450_v9 = vpack.c.bf16 %v390_v6, %v388_v5 }
 0x113   :  { %v451_v11 = vpack.c.bf16 %v391_v8, %v389_v7  ;;  %v245_v12 = vpop.f32.mrb[8].mxu0  ;;  %v2175_v7 = vld [vmem:[#allocation2 + $0xe4] ss:$8 sps:$4 sm:$0xff]   ;;  %1204 = vmatpush1.bf16.msra.mxu0 %v2170_v4 }
 0x114   :  { %v246_v14 = vadd.f32 %v245_v12, %v2655_v35  ;;  %v247_v15 = vpop.f32.mrb[9].mxu0  ;;  %1205 = vmatprep.subr.bf16.mxu0 %v2175_v7 }
 0x115   :  { %v248_v16 = vadd.f32 %v247_v15, %v2658_v36  ;;  %v249_v17 = vpop.f32.mrb[10].mxu0  ;;  %726 = vmatprep.mubr.bf16.mxu1 %v451_v11 }
 0x116   :  { %v250_v18 = vadd.f32 %v249_v17, %v2655_v35  ;;  %v251_v19 = vpop.f32.mrb[11].mxu0  ;;  %727 = vmatmul.mubr.bf16.gmra.mrb[4].mxu1 %v450_v9  ;;  %v392_v23 = vmax.f32 %v246_v14, 0.0  ;;  %v2173_v14 = vld [vmem:[#allocation2 + $0xe0] ss:$8 sps:$4 sm:$0xff]  }
 0x117   :  { %v252_v21 = vadd.f32 %v251_v19, %v2658_v36  ;;  %v393_v25 = vmax.f32 %v248_v16, 0.0  ;;  %1206 = vmatpush1.bf16.msra.mxu0 %v2173_v14 }
 0x118   :  { %v394_v24 = vmax.f32 %v250_v18, 0.0 }
 0x119   :  { %v395_v26 = vmax.f32 %v252_v21, 0.0 }
 0x11a   :  { %v452_v27 = vpack.c.bf16 %v394_v24, %v392_v23 }
 0x11b   :  { %v453_v29 = vpack.c.bf16 %v395_v26, %v393_v25  ;;  %v255_v30 = vpop.f32.mrb[12].mxu0 }
 0x11c   :  { %v256_v33 = vadd.f32 %v255_v30, %v2655_v35  ;;  %v257_v34 = vpop.f32.mrb[13].mxu0 }
 0x11d   :  { %v258_v37 = vadd.f32 %v257_v34, %v2658_v36  ;;  %v259_v38 = vpop.f32.mrb[14].mxu0  ;;  %736 = vmatprep.mubr.bf16.mxu1 %v453_v29 }
 0x11e   :  { %v260_v39 = vadd.f32 %v259_v38, %v2655_v35  ;;  %v261_v40 = vpop.f32.mrb[15].mxu0  ;;  %737 = vmatmul.mubr.bf16.gmra.mrb[8].mxu1 %v452_v27  ;;  %v396_v44 = vmax.f32 %v256_v33, 0.0 }
 0x11f   :  { %v262_v42 = vadd.f32 %v261_v40, %v2658_v36  ;;  %v397_v46 = vmax.f32 %v258_v37, 0.0 }
 0x120   :  { %v398_v45 = vmax.f32 %v260_v39, 0.0 }
 0x121   :  { %v399_v47 = vmax.f32 %v262_v42, 0.0 }
 0x122   :  { %v454_v48 = vpack.c.bf16 %v398_v45, %v396_v44 }
 0x123   :  { %v455_v50 = vpack.c.bf16 %v399_v47, %v397_v46  ;;  %v265_v51 = vpop.f32.mrb[16].mxu0 }
 0x124   :  { %v266_v53 = vadd.f32 %v265_v51, %v2655_v35  ;;  %v267_v54 = vpop.f32.mrb[17].mxu0 }
 0x125   :  { %v268_v55 = vadd.f32 %v267_v54, %v2658_v36  ;;  %v269_v56 = vpop.f32.mrb[18].mxu0  ;;  %746 = vmatprep.mubr.bf16.mxu1 %v455_v50 }
 0x126   :  { %v270_v57 = vadd.f32 %v269_v56, %v2655_v35  ;;  %v271_v58 = vpop.f32.mrb[19].mxu0  ;;  %747 = vmatmul.mubr.bf16.gmra.mrb[12].mxu1 %v454_v48  ;;  %v400_v62 = vmax.f32 %v266_v53, 0.0 }
 0x127   :  { %v272_v60 = vadd.f32 %v271_v58, %v2658_v36  ;;  %v401_v1 = vmax.f32 %v268_v55, 0.0 }
 0x128   :  { %v402_v63 = vmax.f32 %v270_v57, 0.0 }
 0x129   :  { %v403_v2 = vmax.f32 %v272_v60, 0.0 }
 0x12a   :  { %v456_v3 = vpack.c.bf16 %v402_v63, %v400_v62 }
 0x12b   :  { %v457_v5 = vpack.c.bf16 %v403_v2, %v401_v1  ;;  %v275_v6 = vpop.f32.mrb[20].mxu0 }
 0x12c   :  { %v276_v8 = vadd.f32 %v275_v6, %v2655_v35  ;;  %v277_v9 = vpop.f32.mrb[21].mxu0 }
 0x12d   :  { %v278_v10 = vadd.f32 %v277_v9, %v2658_v36  ;;  %v279_v11 = vpop.f32.mrb[22].mxu0  ;;  %756 = vmatprep.mubr.bf16.mxu1 %v457_v5 }
 0x12e   :  { %v280_v12 = vadd.f32 %v279_v11, %v2655_v35  ;;  %v281_v13 = vpop.f32.mrb[23].mxu0  ;;  %757 = vmatmul.mubr.bf16.gmra.mrb[16].mxu1 %v456_v3  ;;  %v404_v16 = vmax.f32 %v276_v8, 0.0 }
 0x12f   :  { %v282_v15 = vadd.f32 %v281_v13, %v2658_v36  ;;  %v405_v18 = vmax.f32 %v278_v10, 0.0 }
 0x130   :  { %v406_v17 = vmax.f32 %v280_v12, 0.0 }
 0x131   :  { %v407_v19 = vmax.f32 %v282_v15, 0.0 }
 0x132   :  { %v458_v20 = vpack.c.bf16 %v406_v17, %v404_v16 }
 0x133   :  { %v459_v21 = vpack.c.bf16 %v407_v19, %v405_v18  ;;  %v285_v22 = vpop.f32.mrb[24].mxu0 }
 0x134   :  { %v286_v23 = vadd.f32 %v285_v22, %v2655_v35  ;;  %v287_v24 = vpop.f32.mrb[25].mxu0 }
 0x135   :  { %v288_v25 = vadd.f32 %v287_v24, %v2658_v36  ;;  %v289_v26 = vpop.f32.mrb[26].mxu0  ;;  %766 = vmatprep.mubr.bf16.mxu1 %v459_v21 }
 0x136   :  { %v290_v27 = vadd.f32 %v289_v26, %v2655_v35  ;;  %v291_v28 = vpop.f32.mrb[27].mxu0  ;;  %767 = vmatmul.mubr.bf16.gmra.mrb[20].mxu1 %v458_v20  ;;  %v408_v30 = vmax.f32 %v286_v23, 0.0 }
 0x137   :  { %v292_v29 = vadd.f32 %v291_v28, %v2658_v36  ;;  %v409_v33 = vmax.f32 %v288_v25, 0.0 }
 0x138   :  { %v410_v31 = vmax.f32 %v290_v27, 0.0 }
 0x139   :  { %v411_v34 = vmax.f32 %v292_v29, 0.0 }
 0x13a   :  { %v460_v37 = vpack.c.bf16 %v410_v31, %v408_v30 }
 0x13b   :  { %v461_v38 = vpack.c.bf16 %v411_v34, %v409_v33  ;;  %v295_v39 = vpop.f32.mrb[28].mxu0 }
 0x13c   :  { %v296_v40 = vadd.f32 %v295_v39, %v2655_v35  ;;  %v297_v41 = vpop.f32.mrb[29].mxu0 }
 0x13d   :  { %v298_v42 = vadd.f32 %v297_v41, %v2658_v36  ;;  %v299_v43 = vpop.f32.mrb[30].mxu0  ;;  %776 = vmatprep.mubr.bf16.mxu1 %v461_v38 }
 0x13e   :  { %v300_v44 = vadd.f32 %v299_v43, %v2655_v35  ;;  %v301_v45 = vpop.f32.mrb[31].mxu0  ;;  %777 = vmatmul.mubr.bf16.gmra.mrb[24].mxu1 %v460_v37  ;;  %v412_v47 = vmax.f32 %v296_v40, 0.0 }
 0x13f   :  { %v302_v46 = vadd.f32 %v301_v45, %v2658_v36  ;;  %v413_v49 = vmax.f32 %v298_v42, 0.0 }
 0x140   :  { %v414_v48 = vmax.f32 %v300_v44, 0.0 }
 0x141   :  { %v415_v50 = vmax.f32 %v302_v46, 0.0 }
 0x142   :  { %v462_v51 = vpack.c.bf16 %v414_v48, %v412_v47 }
 0x143   :  { %v463_v52 = vpack.c.bf16 %v415_v50, %v413_v49  ;;  %v305_v53 = vpop.f32.mrb[32].mxu0 }
 0x144   :  { %v306_v54 = vadd.f32 %v305_v53, %v2655_v35  ;;  %v307_v55 = vpop.f32.mrb[33].mxu0 }
 0x145   :  { %v308_v56 = vadd.f32 %v307_v55, %v2658_v36  ;;  %v309_v57 = vpop.f32.mrb[34].mxu0  ;;  %786 = vmatprep.mubr.bf16.mxu1 %v463_v52 }
 0x146   :  { %v310_v58 = vadd.f32 %v309_v57, %v2655_v35  ;;  %v311_v59 = vpop.f32.mrb[35].mxu0  ;;  %787 = vmatmul.mubr.bf16.gmra.mrb[28].mxu1 %v462_v51  ;;  %v416_v61 = vmax.f32 %v306_v54, 0.0 }
 0x147   :  { %v312_v60 = vadd.f32 %v311_v59, %v2658_v36  ;;  %v417_v63 = vmax.f32 %v308_v56, 0.0  ;;  %v2178_v56 = vld [vmem:[#allocation2 + $0xf4] ss:$8 sps:$4 sm:$0xff]  }
 0x148   :  { %v418_v62 = vmax.f32 %v310_v58, 0.0  ;;  %v2176_v58 = vld [vmem:[#allocation2 + $0xf0] ss:$8 sps:$4 sm:$0xff]   ;;  %1207 = vmatprep.subr.bf16.mxu0 %v2178_v56 }
 0x149   :  { %v419_v1 = vmax.f32 %v312_v60, 0.0  ;;  %1208 = vmatpush1.bf16.msra.mxu0 %v2176_v58 }
 0x14a   :  { %v464_v2 = vpack.c.bf16 %v418_v62, %v416_v61 }
 0x14b   :  { %v465_v3 = vpack.c.bf16 %v419_v1, %v417_v63  ;;  %v315_v4 = vpop.f32.mrb[36].mxu0 }
 0x14c   :  { %v316_v5 = vadd.f32 %v315_v4, %v2655_v35  ;;  %v317_v6 = vpop.f32.mrb[37].mxu0 }
 0x14d   :  { %v318_v7 = vadd.f32 %v317_v6, %v2658_v36  ;;  %v319_v8 = vpop.f32.mrb[38].mxu0  ;;  %796 = vmatprep.mubr.bf16.mxu1 %v465_v3 }
 0x14e   :  { %v320_v9 = vadd.f32 %v319_v8, %v2655_v35  ;;  %v321_v10 = vpop.f32.mrb[39].mxu0  ;;  %797 = vmatmul.mubr.bf16.gmra.mrb[32].mxu1 %v464_v2  ;;  %v420_v12 = vmax.f32 %v316_v5, 0.0 }
 0x14f   :  { %v322_v11 = vadd.f32 %v321_v10, %v2658_v36  ;;  %v421_v14 = vmax.f32 %v318_v7, 0.0 }
 0x150   :  { %v422_v13 = vmax.f32 %v320_v9, 0.0 }
 0x151   :  { %v423_v15 = vmax.f32 %v322_v11, 0.0 }
 0x152   :  { %v466_v16 = vpack.c.bf16 %v422_v13, %v420_v12 }
 0x153   :  { %v467_v17 = vpack.c.bf16 %v423_v15, %v421_v14  ;;  %v325_v18 = vpop.f32.mrb[40].mxu0 }
 0x154   :  { %v326_v19 = vadd.f32 %v325_v18, %v2655_v35  ;;  %v327_v20 = vpop.f32.mrb[41].mxu0 }
 0x155   :  { %v328_v21 = vadd.f32 %v327_v20, %v2658_v36  ;;  %v329_v22 = vpop.f32.mrb[42].mxu0  ;;  %806 = vmatprep.mubr.bf16.mxu1 %v467_v17 }
 0x156   :  { %v330_v23 = vadd.f32 %v329_v22, %v2655_v35  ;;  %v331_v24 = vpop.f32.mrb[43].mxu0  ;;  %807 = vmatmul.mubr.bf16.gmra.mrb[36].mxu1 %v466_v16  ;;  %v424_v26 = vmax.f32 %v326_v19, 0.0 }
 0x157   :  { %v332_v25 = vadd.f32 %v331_v24, %v2658_v36  ;;  %v425_v28 = vmax.f32 %v328_v21, 0.0 }
 0x158   :  { %v426_v27 = vmax.f32 %v330_v23, 0.0 }
 0x159   :  { %v427_v29 = vmax.f32 %v332_v25, 0.0 }
 0x15a   :  { %v468_v30 = vpack.c.bf16 %v426_v27, %v424_v26 }
 0x15b   :  { %v469_v31 = vpack.c.bf16 %v427_v29, %v425_v28  ;;  %v335_v33 = vpop.f32.mrb[44].mxu0 }
 0x15c   :  { %v336_v34 = vadd.f32 %v335_v33, %v2655_v35  ;;  %v337_v37 = vpop.f32.mrb[45].mxu0 }
 0x15d   :  { %v338_v38 = vadd.f32 %v337_v37, %v2658_v36  ;;  %v339_v39 = vpop.f32.mrb[46].mxu0  ;;  %816 = vmatprep.mubr.bf16.mxu1 %v469_v31 }
 0x15e   :  { %v340_v40 = vadd.f32 %v339_v39, %v2655_v35  ;;  %v341_v41 = vpop.f32.mrb[47].mxu0  ;;  %817 = vmatmul.mubr.bf16.gmra.mrb[40].mxu1 %v468_v30  ;;  %v428_v43 = vmax.f32 %v336_v34, 0.0 }
 0x15f   :  { %v342_v42 = vadd.f32 %v341_v41, %v2658_v36  ;;  %v429_v45 = vmax.f32 %v338_v38, 0.0 }
 0x160   :  { %v430_v44 = vmax.f32 %v340_v40, 0.0 }
 0x161   :  { %v431_v46 = vmax.f32 %v342_v42, 0.0 }
 0x162   :  { %v470_v47 = vpack.c.bf16 %v430_v44, %v428_v43 }
 0x163   :  { %v471_v48 = vpack.c.bf16 %v431_v46, %v429_v45  ;;  %v345_v49 = vpop.f32.mrb[48].mxu0 }
 0x164   :  { %v346_v50 = vadd.f32 %v345_v49, %v2655_v35  ;;  %v347_v51 = vpop.f32.mrb[49].mxu0 }
 0x165   :  { %v348_v52 = vadd.f32 %v347_v51, %v2658_v36  ;;  %v349_v53 = vpop.f32.mrb[50].mxu0  ;;  %826 = vmatprep.mubr.bf16.mxu1 %v471_v48 }
 0x166   :  { %v350_v54 = vadd.f32 %v349_v53, %v2655_v35  ;;  %v351_v55 = vpop.f32.mrb[51].mxu0  ;;  %827 = vmatmul.mubr.bf16.gmra.mrb[44].mxu1 %v470_v47  ;;  %v432_v59 = vmax.f32 %v346_v50, 0.0  ;;  %v512_v47 = vld [vmem:[%s2926_s4] sm:$0x3] }
 0x167   :  { %v352_v57 = vadd.f32 %v351_v55, %v2658_v36  ;;  %v433_v61 = vmax.f32 %v348_v52, 0.0  ;;  %v2728_v48 = vrot.slane %v512_v47, %v2647_v0  ;;  %v2180_v52 = vld [vmem:[#allocation5] sm:$0xff]  }
 0x168   :  { %v434_v60 = vmax.f32 %v350_v54, 0.0 }
 0x169   :  { %v435_v62 = vmax.f32 %v352_v57, 0.0  ;;  %v2181_v57 = vld [vmem:[#allocation5 + $0x48] sm:$0xff]  }
 0x16a   :  { %v472_v63 = vpack.c.bf16 %v434_v60, %v432_v59 }
 0x16b   :  { %v473_v1 = vpack.c.bf16 %v435_v62, %v433_v61  ;;  %v355_v2 = vpop.f32.mrb[52].mxu0  ;;  %v2182_v61 = vld [vmem:[#allocation5 + $0x8] sm:$0xff]  }
 0x16c   :  { %v356_v3 = vadd.f32 %v355_v2, %v2655_v35  ;;  %v357_v4 = vpop.f32.mrb[53].mxu0 }
 0x16d   :  { %v358_v5 = vadd.f32 %v357_v4, %v2658_v36  ;;  %v359_v6 = vpop.f32.mrb[54].mxu0  ;;  %836 = vmatprep.mubr.bf16.mxu1 %v473_v1  ;;  %v2183_v1 = vld [vmem:[#allocation5 + $0x50] sm:$0xff]  }
 0x16e   :  { %v360_v7 = vadd.f32 %v359_v6, %v2655_v35  ;;  %v361_v8 = vpop.f32.mrb[55].mxu0  ;;  %837 = vmatmul.mubr.bf16.gmra.mrb[48].mxu1 %v472_v63  ;;  %v436_v10 = vmax.f32 %v356_v3, 0.0 }
 0x16f   :  { %v362_v9 = vadd.f32 %v361_v8, %v2658_v36  ;;  %v437_v12 = vmax.f32 %v358_v5, 0.0 }
 0x170   :  { %v438_v11 = vmax.f32 %v360_v7, 0.0  ;;  %v2184_v7 = vld [vmem:[#allocation5 + $0x10] sm:$0xff]  }
 0x171   :  { %v439_v13 = vmax.f32 %v362_v9, 0.0 }
 0x172   :  { %v474_v14 = vpack.c.bf16 %v438_v11, %v436_v10  ;;  %v2185_v10 = vld [vmem:[#allocation5 + $0x58] sm:$0xff]  }
 0x173   :  { %v475_v15 = vpack.c.bf16 %v439_v13, %v437_v12  ;;  %v365_v16 = vpop.f32.mrb[56].mxu0 }
 0x174   :  { %v366_v17 = vadd.f32 %v365_v16, %v2655_v35  ;;  %v367_v18 = vpop.f32.mrb[57].mxu0  ;;  %v2186_v16 = vld [vmem:[#allocation5 + $0x18] sm:$0xff]  }
 0x175   :  { %v368_v19 = vadd.f32 %v367_v18, %v2658_v36  ;;  %v369_v20 = vpop.f32.mrb[58].mxu0  ;;  %846 = vmatprep.mubr.bf16.mxu1 %v475_v15 }
 0x176   :  { %v370_v21 = vadd.f32 %v369_v20, %v2655_v35  ;;  %v371_v22 = vpop.f32.mrb[59].mxu0  ;;  %847 = vmatmul.mubr.bf16.gmra.mrb[52].mxu1 %v474_v14  ;;  %v440_v24 = vmax.f32 %v366_v17, 0.0 }
 0x177   :  { %v372_v23 = vadd.f32 %v371_v22, %v2658_v36  ;;  %v441_v26 = vmax.f32 %v368_v19, 0.0  ;;  %v2187_v19 = vld [vmem:[#allocation5 + $0x60] sm:$0xff]  }
 0x178   :  { %v442_v25 = vmax.f32 %v370_v21, 0.0 }
 0x179   :  { %v443_v27 = vmax.f32 %v372_v23, 0.0 }
 0x17a   :  { %v476_v28 = vpack.c.bf16 %v442_v25, %v440_v24  ;;  %v2188_v25 = vld [vmem:[#allocation5 + $0x20] sm:$0xff]  }
 0x17b   :  { %v477_v29 = vpack.c.bf16 %v443_v27, %v441_v26  ;;  %v375_v30 = vpop.f32.mrb[60].mxu0 }
 0x17c   :  { %v376_v31 = vadd.f32 %v375_v30, %v2655_v35  ;;  %v377_v33 = vpop.f32.mrb[61].mxu0 }
 0x17d   :  { %v378_v34 = vadd.f32 %v377_v33, %v2658_v36  ;;  %v379_v37 = vpop.f32.mrb[62].mxu0  ;;  %856 = vmatprep.mubr.bf16.mxu1 %v477_v29 }
 0x17e   :  { %v380_v38 = vadd.f32 %v379_v37, %v2655_v35  ;;  %v381_v39 = vpop.f32.mrb[63].mxu0  ;;  %857 = vmatmul.mubr.bf16.gmra.mrb[56].mxu1 %v476_v28  ;;  %v444_v41 = vmax.f32 %v376_v31, 0.0  ;;  %v2731_v35 = vrot.slane %v512_v47, %v2652_v32  ;;  %v2189_v28 = vld [vmem:[#allocation5 + $0x68] sm:$0xff]  }
 0x17f   :  { %v382_v40 = vadd.f32 %v381_v39, %v2658_v36  ;;  %v445_v43 = vmax.f32 %v378_v34, 0.0  ;;  %v2179_v36 = vld [vmem:[#allocation5 + $0x40] sm:$0xff]   ;;  %v2190_v37 = vld [vmem:[#allocation5 + $0x28] sm:$0xff]  }
 0x180   :  { %v446_v42 = vmax.f32 %v380_v38, 0.0  ;;  %2055 = vmatprep.subr.bf16.mxu1 %v2179_v36  ;;  %1943 = vmatprep.subr.bf16.mxu0 %v2179_v36 }
 0x181   :  { %v447_v44 = vmax.f32 %v382_v40, 0.0  ;;  %2063 = vmatpush3.bf16.msra.mxu1 %v2180_v52 }
 0x182   :  { %v478_v45 = vpack.c.bf16 %v446_v42, %v444_v41  ;;  %2056 = vmatprep.subr.bf16.mxu1 %v2181_v57 }
 0x183   :  { %v479_v46 = vpack.c.bf16 %v447_v44, %v445_v43 }
 0x185   :  { %866 = vmatprep.mubr.bf16.mxu1 %v479_v46  ;;  %2064 = vmatpush3.bf16.msra.mxu1 %v2182_v61 }
 0x186   :  { %867 = vmatmul.mubr.bf16.gmra.mrb[60].mxu1 %v478_v45  ;;  %2057 = vmatprep.subr.bf16.mxu1 %v2183_v1 }
 0x189   :  { %2065 = vmatpush3.bf16.msra.mxu1 %v2184_v7 }
 0x18a   :  { %2058 = vmatprep.subr.bf16.mxu1 %v2185_v10 }
 0x18d   :  { %2066 = vmatpush3.bf16.msra.mxu1 %v2186_v16 }
 0x18e   :  { %2059 = vmatprep.subr.bf16.mxu1 %v2187_v19 }
 0x191   :  { %2067 = vmatpush3.bf16.msra.mxu1 %v2188_v25 }
 0x192   :  { %2060 = vmatprep.subr.bf16.mxu1 %v2189_v28 }
 0x195   :  { %2068 = vmatpush3.bf16.msra.mxu1 %v2190_v37 }
 0x1e1   :  { %v718_v49 = vpop.f32.mrb[0].mxu1 }
 0x1e2   :  { %v719_v50 = vadd.f32 %v718_v49, %v2728_v48  ;;  %v720_v51 = vpop.f32.mrb[1].mxu1 }
 0x1e3   :  { %v721_v53 = vadd.f32 %v720_v51, %v2731_v35  ;;  %v722_v54 = vpop.f32.mrb[2].mxu1 }
 0x1e4   :  { %v723_v55 = vadd.f32 %v722_v54, %v2728_v48  ;;  %v724_v56 = vpop.f32.mrb[3].mxu1  ;;  %v877_v59 = vmax.f32 %v719_v50, 0.0 }
 0x1e5   :  { %v725_v58 = vadd.f32 %v724_v56, %v2731_v35  ;;  %v878_v62 = vmax.f32 %v721_v53, 0.0 }
 0x1e6   :  { %v879_v60 = vmax.f32 %v723_v55, 0.0 }
 0x1e7   :  { %v880_v63 = vmax.f32 %v725_v58, 0.0 }
 0x1e8   :  { %v941_v2 = vpack.c.bf16 %v879_v60, %v877_v59 }
 0x1e9   :  { %v942_v3 = vpack.c.bf16 %v880_v63, %v878_v62  ;;  %v728_v4 = vpop.f32.mrb[4].mxu1 }
 0x1ea   :  { %v729_v5 = vadd.f32 %v728_v4, %v2728_v48  ;;  %v730_v6 = vpop.f32.mrb[5].mxu1 }
 0x1eb   :  { %v731_v8 = vadd.f32 %v730_v6, %v2731_v35  ;;  %v732_v9 = vpop.f32.mrb[6].mxu1  ;;  %1209 = vmatprep.mubr.bf16.mxu0 %v942_v3 }
 0x1ec   :  { %v733_v11 = vadd.f32 %v732_v9, %v2728_v48  ;;  %v734_v12 = vpop.f32.mrb[7].mxu1  ;;  %1210 = vmatmul.mubr.bf16.vlgmr.msra.gmra.mrb[64].mxu0 %v941_v2  ;;  %v881_v14 = vmax.f32 %v729_v5, 0.0 }
 0x1ed   :  { %v735_v13 = vadd.f32 %v734_v12, %v2731_v35  ;;  %1944 = vmatpush3.bf16.msra.mxu0 %v2180_v52  ;;  %v882_v17 = vmax.f32 %v731_v8, 0.0 }
 0x1ee   :  { %v883_v15 = vmax.f32 %v733_v11, 0.0  ;;  %1945 = vmatprep.subr.bf16.mxu0 %v2181_v57 }
 0x1ef   :  { %v884_v18 = vmax.f32 %v735_v13, 0.0 }
 0x1f0   :  { %v943_v20 = vpack.c.bf16 %v883_v15, %v881_v14 }
 0x1f1   :  { %v944_v21 = vpack.c.bf16 %v884_v18, %v882_v17  ;;  %v738_v22 = vpop.f32.mrb[8].mxu1  ;;  %1946 = vmatpush3.bf16.msra.mxu0 %v2182_v61 }
 0x1f2   :  { %v739_v23 = vadd.f32 %v738_v22, %v2728_v48  ;;  %v740_v24 = vpop.f32.mrb[9].mxu1  ;;  %1947 = vmatprep.subr.bf16.mxu0 %v2183_v1 }
 0x1f3   :  { %v741_v26 = vadd.f32 %v740_v24, %v2731_v35  ;;  %v742_v27 = vpop.f32.mrb[10].mxu1  ;;  %1219 = vmatprep.mubr.bf16.mxu0 %v944_v21 }
 0x1f4   :  { %v743_v29 = vadd.f32 %v742_v27, %v2728_v48  ;;  %v744_v30 = vpop.f32.mrb[11].mxu1  ;;  %1220 = vmatmul.mubr.bf16.gmra.mrb[68].mxu0 %v943_v20  ;;  %v885_v33 = vmax.f32 %v739_v23, 0.0 }
 0x1f5   :  { %v745_v31 = vadd.f32 %v744_v30, %v2731_v35  ;;  %1948 = vmatpush3.bf16.msra.mxu0 %v2184_v7  ;;  %v886_v38 = vmax.f32 %v741_v26, 0.0 }
 0x1f6   :  { %v887_v34 = vmax.f32 %v743_v29, 0.0  ;;  %1949 = vmatprep.subr.bf16.mxu0 %v2185_v10 }
 0x1f7   :  { %v888_v39 = vmax.f32 %v745_v31, 0.0 }
 0x1f8   :  { %v945_v40 = vpack.c.bf16 %v887_v34, %v885_v33 }
 0x1f9   :  { %v946_v41 = vpack.c.bf16 %v888_v39, %v886_v38  ;;  %v748_v42 = vpop.f32.mrb[12].mxu1  ;;  %1950 = vmatpush3.bf16.msra.mxu0 %v2186_v16 }
 0x1fa   :  { %v749_v43 = vadd.f32 %v748_v42, %v2728_v48  ;;  %v750_v44 = vpop.f32.mrb[13].mxu1  ;;  %1951 = vmatprep.subr.bf16.mxu0 %v2187_v19 }
 0x1fb   :  { %v751_v45 = vadd.f32 %v750_v44, %v2731_v35  ;;  %v752_v46 = vpop.f32.mrb[14].mxu1  ;;  %1229 = vmatprep.mubr.bf16.mxu0 %v946_v41 }
 0x1fc   :  { %v753_v47 = vadd.f32 %v752_v46, %v2728_v48  ;;  %v754_v49 = vpop.f32.mrb[15].mxu1  ;;  %1230 = vmatmul.mubr.bf16.gmra.mrb[72].mxu0 %v945_v40  ;;  %v889_v50 = vmax.f32 %v749_v43, 0.0 }
 0x1fd   :  { %v755_v36 = vadd.f32 %v754_v49, %v2731_v35  ;;  %1952 = vmatpush3.bf16.msra.mxu0 %v2188_v25  ;;  %v890_v52 = vmax.f32 %v751_v45, 0.0 }
 0x1fe   :  { %v891_v51 = vmax.f32 %v753_v47, 0.0  ;;  %1953 = vmatprep.subr.bf16.mxu0 %v2189_v28 }
 0x1ff   :  { %v892_v53 = vmax.f32 %v755_v36, 0.0 }
 0x200   :  { %v947_v54 = vpack.c.bf16 %v891_v51, %v889_v50 }
 0x201   :  { %v948_v55 = vpack.c.bf16 %v892_v53, %v890_v52  ;;  %v758_v56 = vpop.f32.mrb[16].mxu1  ;;  %1954 = vmatpush3.bf16.msra.mxu0 %v2190_v37 }
 0x202   :  { %v759_v57 = vadd.f32 %v758_v56, %v2728_v48  ;;  %v760_v58 = vpop.f32.mrb[17].mxu1 }
 0x203   :  { %v761_v59 = vadd.f32 %v760_v58, %v2731_v35  ;;  %v762_v60 = vpop.f32.mrb[18].mxu1  ;;  %1239 = vmatprep.mubr.bf16.mxu0 %v948_v55 }
 0x204   :  { %v763_v61 = vadd.f32 %v762_v60, %v2728_v48  ;;  %v764_v62 = vpop.f32.mrb[19].mxu1  ;;  %1240 = vmatmul.mubr.bf16.gmra.mrb[76].mxu0 %v947_v54  ;;  %v893_v1 = vmax.f32 %v759_v57, 0.0 }
 0x205   :  { %v765_v63 = vadd.f32 %v764_v62, %v2731_v35  ;;  %v894_v3 = vmax.f32 %v761_v59, 0.0 }
 0x206   :  { %v895_v2 = vmax.f32 %v763_v61, 0.0 }
 0x207   :  { %v896_v4 = vmax.f32 %v765_v63, 0.0 }
 0x208   :  { %v949_v5 = vpack.c.bf16 %v895_v2, %v893_v1 }
 0x209   :  { %v950_v6 = vpack.c.bf16 %v896_v4, %v894_v3  ;;  %v768_v7 = vpop.f32.mrb[20].mxu1 }
 0x20a   :  { %v769_v8 = vadd.f32 %v768_v7, %v2728_v48  ;;  %v770_v9 = vpop.f32.mrb[21].mxu1 }
 0x20b   :  { %v771_v10 = vadd.f32 %v770_v9, %v2731_v35  ;;  %v772_v11 = vpop.f32.mrb[22].mxu1  ;;  %1249 = vmatprep.mubr.bf16.mxu0 %v950_v6 }
 0x20c   :  { %v773_v12 = vadd.f32 %v772_v11, %v2728_v48  ;;  %v774_v13 = vpop.f32.mrb[23].mxu1  ;;  %1250 = vmatmul.mubr.bf16.gmra.mrb[80].mxu0 %v949_v5  ;;  %v897_v15 = vmax.f32 %v769_v8, 0.0 }
 0x20d   :  { %v775_v14 = vadd.f32 %v774_v13, %v2731_v35  ;;  %v898_v17 = vmax.f32 %v771_v10, 0.0 }
 0x20e   :  { %v899_v16 = vmax.f32 %v773_v12, 0.0 }
 0x20f   :  { %v900_v18 = vmax.f32 %v775_v14, 0.0 }
 0x210   :  { %v951_v19 = vpack.c.bf16 %v899_v16, %v897_v15 }
 0x211   :  { %v952_v20 = vpack.c.bf16 %v900_v18, %v898_v17  ;;  %v778_v21 = vpop.f32.mrb[24].mxu1 }
 0x212   :  { %v779_v22 = vadd.f32 %v778_v21, %v2728_v48  ;;  %v780_v23 = vpop.f32.mrb[25].mxu1 }
 0x213   :  { %v781_v24 = vadd.f32 %v780_v23, %v2731_v35  ;;  %v782_v25 = vpop.f32.mrb[26].mxu1  ;;  %1259 = vmatprep.mubr.bf16.mxu0 %v952_v20 }
 0x214   :  { %v783_v26 = vadd.f32 %v782_v25, %v2728_v48  ;;  %v784_v27 = vpop.f32.mrb[27].mxu1  ;;  %1260 = vmatmul.mubr.bf16.gmra.mrb[84].mxu0 %v951_v19  ;;  %v901_v29 = vmax.f32 %v779_v22, 0.0 }
 0x215   :  { %v785_v28 = vadd.f32 %v784_v27, %v2731_v35  ;;  %v902_v31 = vmax.f32 %v781_v24, 0.0 }
 0x216   :  { %v903_v30 = vmax.f32 %v783_v26, 0.0 }
 0x217   :  { %v904_v33 = vmax.f32 %v785_v28, 0.0 }
 0x218   :  { %v953_v34 = vpack.c.bf16 %v903_v30, %v901_v29 }
 0x219   :  { %v954_v37 = vpack.c.bf16 %v904_v33, %v902_v31  ;;  %v788_v38 = vpop.f32.mrb[28].mxu1 }
 0x21a   :  { %v789_v39 = vadd.f32 %v788_v38, %v2728_v48  ;;  %v790_v40 = vpop.f32.mrb[29].mxu1 }
 0x21b   :  { %v791_v41 = vadd.f32 %v790_v40, %v2731_v35  ;;  %v792_v42 = vpop.f32.mrb[30].mxu1  ;;  %1269 = vmatprep.mubr.bf16.mxu0 %v954_v37 }
 0x21c   :  { %v793_v43 = vadd.f32 %v792_v42, %v2728_v48  ;;  %v794_v44 = vpop.f32.mrb[31].mxu1  ;;  %1270 = vmatmul.mubr.bf16.gmra.mrb[88].mxu0 %v953_v34  ;;  %v905_v46 = vmax.f32 %v789_v39, 0.0 }
 0x21d   :  { %v795_v45 = vadd.f32 %v794_v44, %v2731_v35  ;;  %v906_v49 = vmax.f32 %v791_v41, 0.0 }
 0x21e   :  { %v907_v47 = vmax.f32 %v793_v43, 0.0 }
 0x21f   :  { %v908_v36 = vmax.f32 %v795_v45, 0.0 }
 0x220   :  { %v955_v50 = vpack.c.bf16 %v907_v47, %v905_v46  ;;  %v2191_v47 = vld [vmem:[#allocation5 + $0x70] sm:$0xff]  }
 0x221   :  { %v956_v51 = vpack.c.bf16 %v908_v36, %v906_v49  ;;  %v798_v52 = vpop.f32.mrb[32].mxu1  ;;  %2061 = vmatprep.subr.bf16.mxu1 %v2191_v47  ;;  %1955 = vmatprep.subr.bf16.mxu0 %v2191_v47 }
 0x222   :  { %v799_v53 = vadd.f32 %v798_v52, %v2728_v48  ;;  %v800_v54 = vpop.f32.mrb[33].mxu1 }
 0x223   :  { %v801_v55 = vadd.f32 %v800_v54, %v2731_v35  ;;  %v802_v56 = vpop.f32.mrb[34].mxu1  ;;  %1279 = vmatprep.mubr.bf16.mxu0 %v956_v51 }
 0x224   :  { %v803_v57 = vadd.f32 %v802_v56, %v2728_v48  ;;  %v804_v58 = vpop.f32.mrb[35].mxu1  ;;  %1280 = vmatmul.mubr.bf16.gmra.mrb[92].mxu0 %v955_v50  ;;  %v909_v60 = vmax.f32 %v799_v53, 0.0  ;;  %v2192_v50 = vld [vmem:[#allocation5 + $0x30] sm:$0xff]  }
 0x225   :  { %v805_v59 = vadd.f32 %v804_v58, %v2731_v35  ;;  %v910_v62 = vmax.f32 %v801_v55, 0.0  ;;  %2069 = vmatpush3.bf16.msra.mxu1 %v2192_v50  ;;  %1956 = vmatpush3.bf16.msra.mxu0 %v2192_v50 }
 0x226   :  { %v911_v61 = vmax.f32 %v803_v57, 0.0  ;;  %v2193_v57 = vld [vmem:[#allocation5 + $0x78] sm:$0xff]  }
 0x227   :  { %v912_v63 = vmax.f32 %v805_v59, 0.0  ;;  %v2194_v59 = vld [vmem:[#allocation5 + $0x38] sm:$0xff]   ;;  %1957 = vmatprep.subr.bf16.mxu0 %v2193_v57  ;;  %2062 = vmatprep.subr.bf16.mxu1 %v2193_v57 }
 0x228   :  { %v957_v1 = vpack.c.bf16 %v911_v61, %v909_v60 }
 0x229   :  { %v958_v2 = vpack.c.bf16 %v912_v63, %v910_v62  ;;  %v808_v3 = vpop.f32.mrb[36].mxu1  ;;  %2070 = vmatpush3.bf16.msra.mxu1 %v2194_v59  ;;  %1958 = vmatpush3.bf16.msra.mxu0 %v2194_v59 }
 0x22a   :  { %v809_v4 = vadd.f32 %v808_v3, %v2728_v48  ;;  %v810_v5 = vpop.f32.mrb[37].mxu1 }
 0x22b   :  { %v811_v6 = vadd.f32 %v810_v5, %v2731_v35  ;;  %v812_v7 = vpop.f32.mrb[38].mxu1  ;;  %1289 = vmatprep.mubr.bf16.mxu0 %v958_v2 }
 0x22c   :  { %v813_v8 = vadd.f32 %v812_v7, %v2728_v48  ;;  %v814_v9 = vpop.f32.mrb[39].mxu1  ;;  %1290 = vmatmul.mubr.bf16.gmra.mrb[96].mxu0 %v957_v1  ;;  %v913_v11 = vmax.f32 %v809_v4, 0.0 }
 0x22d   :  { %v815_v10 = vadd.f32 %v814_v9, %v2731_v35  ;;  %v914_v13 = vmax.f32 %v811_v6, 0.0 }
 0x22e   :  { %v915_v12 = vmax.f32 %v813_v8, 0.0 }
 0x22f   :  { %v916_v14 = vmax.f32 %v815_v10, 0.0 }
 0x230   :  { %v959_v15 = vpack.c.bf16 %v915_v12, %v913_v11 }
 0x231   :  { %v960_v16 = vpack.c.bf16 %v916_v14, %v914_v13  ;;  %v818_v17 = vpop.f32.mrb[40].mxu1 }
 0x232   :  { %v819_v18 = vadd.f32 %v818_v17, %v2728_v48  ;;  %v820_v19 = vpop.f32.mrb[41].mxu1 }
 0x233   :  { %v821_v20 = vadd.f32 %v820_v19, %v2731_v35  ;;  %v822_v21 = vpop.f32.mrb[42].mxu1  ;;  %1299 = vmatprep.mubr.bf16.mxu0 %v960_v16 }
 0x234   :  { %v823_v22 = vadd.f32 %v822_v21, %v2728_v48  ;;  %v824_v23 = vpop.f32.mrb[43].mxu1  ;;  %1300 = vmatmul.mubr.bf16.gmra.mrb[100].mxu0 %v959_v15  ;;  %v917_v25 = vmax.f32 %v819_v18, 0.0 }
 0x235   :  { %v825_v24 = vadd.f32 %v824_v23, %v2731_v35  ;;  %v918_v27 = vmax.f32 %v821_v20, 0.0 }
 0x236   :  { %v919_v26 = vmax.f32 %v823_v22, 0.0 }
 0x237   :  { %v920_v28 = vmax.f32 %v825_v24, 0.0 }
 0x238   :  { %v961_v29 = vpack.c.bf16 %v919_v26, %v917_v25 }
 0x239   :  { %v962_v30 = vpack.c.bf16 %v920_v28, %v918_v27  ;;  %v828_v31 = vpop.f32.mrb[44].mxu1 }
 0x23a   :  { %v829_v33 = vadd.f32 %v828_v31, %v2728_v48  ;;  %v830_v34 = vpop.f32.mrb[45].mxu1 }
 0x23b   :  { %v831_v37 = vadd.f32 %v830_v34, %v2731_v35  ;;  %v832_v38 = vpop.f32.mrb[46].mxu1  ;;  %1309 = vmatprep.mubr.bf16.mxu0 %v962_v30 }
 0x23c   :  { %v833_v39 = vadd.f32 %v832_v38, %v2728_v48  ;;  %v834_v40 = vpop.f32.mrb[47].mxu1  ;;  %1310 = vmatmul.mubr.bf16.gmra.mrb[104].mxu0 %v961_v29  ;;  %v921_v42 = vmax.f32 %v829_v33, 0.0 }
 0x23d   :  { %v835_v41 = vadd.f32 %v834_v40, %v2731_v35  ;;  %v922_v44 = vmax.f32 %v831_v37, 0.0 }
 0x23e   :  { %v923_v43 = vmax.f32 %v833_v39, 0.0 }
 0x23f   :  { %v924_v45 = vmax.f32 %v835_v41, 0.0 }
 0x240   :  { %v963_v46 = vpack.c.bf16 %v923_v43, %v921_v42 }
 0x241   :  { %v964_v49 = vpack.c.bf16 %v924_v45, %v922_v44  ;;  %v838_v36 = vpop.f32.mrb[48].mxu1 }
 0x242   :  { %v839_v51 = vadd.f32 %v838_v36, %v2728_v48  ;;  %v840_v52 = vpop.f32.mrb[49].mxu1 }
 0x243   :  { %v841_v53 = vadd.f32 %v840_v52, %v2731_v35  ;;  %v842_v54 = vpop.f32.mrb[50].mxu1  ;;  %1319 = vmatprep.mubr.bf16.mxu0 %v964_v49  ;;  %v1005_v49 = vld [vmem:[%s2928_s6] sm:$0x3] }
 0x244   :  { %v843_v55 = vadd.f32 %v842_v54, %v2728_v48  ;;  %v844_v56 = vpop.f32.mrb[51].mxu1  ;;  %1320 = vmatmul.mubr.bf16.gmra.mrb[108].mxu0 %v963_v46  ;;  %v925_v60 = vmax.f32 %v839_v51, 0.0  ;;  %v2801_v36 = vrot.slane %v1005_v49, %v2647_v0 }
 0x245   :  { %v845_v58 = vadd.f32 %v844_v56, %v2731_v35  ;;  %v926_v62 = vmax.f32 %v841_v53, 0.0 }
 0x246   :  { %v927_v61 = vmax.f32 %v843_v55, 0.0 }
 0x247   :  { %v928_v63 = vmax.f32 %v845_v58, 0.0 }
 0x248   :  { %v965_v1 = vpack.c.bf16 %v927_v61, %v925_v60 }
 0x249   :  { %v966_v2 = vpack.c.bf16 %v928_v63, %v926_v62  ;;  %v848_v3 = vpop.f32.mrb[52].mxu1 }
 0x24a   :  { %v849_v4 = vadd.f32 %v848_v3, %v2728_v48  ;;  %v850_v5 = vpop.f32.mrb[53].mxu1 }
 0x24b   :  { %v851_v6 = vadd.f32 %v850_v5, %v2731_v35  ;;  %v852_v7 = vpop.f32.mrb[54].mxu1  ;;  %1329 = vmatprep.mubr.bf16.mxu0 %v966_v2 }
 0x24c   :  { %v853_v8 = vadd.f32 %v852_v7, %v2728_v48  ;;  %v854_v9 = vpop.f32.mrb[55].mxu1  ;;  %1330 = vmatmul.mubr.bf16.gmra.mrb[112].mxu0 %v965_v1  ;;  %v929_v11 = vmax.f32 %v849_v4, 0.0 }
 0x24d   :  { %v855_v10 = vadd.f32 %v854_v9, %v2731_v35  ;;  %v930_v13 = vmax.f32 %v851_v6, 0.0 }
 0x24e   :  { %v931_v12 = vmax.f32 %v853_v8, 0.0 }
 0x24f   :  { %v932_v14 = vmax.f32 %v855_v10, 0.0 }
 0x250   :  { %v967_v15 = vpack.c.bf16 %v931_v12, %v929_v11 }
 0x251   :  { %v968_v16 = vpack.c.bf16 %v932_v14, %v930_v13  ;;  %v858_v17 = vpop.f32.mrb[56].mxu1 }
 0x252   :  { %v859_v18 = vadd.f32 %v858_v17, %v2728_v48  ;;  %v860_v19 = vpop.f32.mrb[57].mxu1 }
 0x253   :  { %v861_v20 = vadd.f32 %v860_v19, %v2731_v35  ;;  %v862_v21 = vpop.f32.mrb[58].mxu1  ;;  %1339 = vmatprep.mubr.bf16.mxu0 %v968_v16 }
 0x254   :  { %v863_v22 = vadd.f32 %v862_v21, %v2728_v48  ;;  %v864_v23 = vpop.f32.mrb[59].mxu1  ;;  %1340 = vmatmul.mubr.bf16.gmra.mrb[116].mxu0 %v967_v15  ;;  %v933_v25 = vmax.f32 %v859_v18, 0.0 }
 0x255   :  { %v865_v24 = vadd.f32 %v864_v23, %v2731_v35  ;;  %v934_v27 = vmax.f32 %v861_v20, 0.0 }
 0x256   :  { %v935_v26 = vmax.f32 %v863_v22, 0.0 }
 0x257   :  { %v936_v28 = vmax.f32 %v865_v24, 0.0 }
 0x258   :  { %v969_v29 = vpack.c.bf16 %v935_v26, %v933_v25 }
 0x259   :  { %v970_v30 = vpack.c.bf16 %v936_v28, %v934_v27  ;;  %v868_v31 = vpop.f32.mrb[60].mxu1 }
 0x25a   :  { %v869_v33 = vadd.f32 %v868_v31, %v2728_v48  ;;  %v870_v34 = vpop.f32.mrb[61].mxu1 }
 0x25b   :  { %v871_v37 = vadd.f32 %v870_v34, %v2731_v35  ;;  %v872_v38 = vpop.f32.mrb[62].mxu1  ;;  %1349 = vmatprep.mubr.bf16.mxu0 %v970_v30 }
 0x25c   :  { %v873_v39 = vadd.f32 %v872_v38, %v2728_v48  ;;  %v874_v40 = vpop.f32.mrb[63].mxu1  ;;  %1350 = vmatmul.mubr.bf16.gmra.mrb[120].mxu0 %v969_v29  ;;  %v937_v42 = vmax.f32 %v869_v33, 0.0  ;;  %v2804_v48 = vrot.slane %v1005_v49, %v2652_v32 }
 0x25d   :  { %v875_v41 = vadd.f32 %v874_v40, %v2731_v35  ;;  %v938_v44 = vmax.f32 %v871_v37, 0.0 }
 0x25e   :  { %v939_v43 = vmax.f32 %v873_v39, 0.0 }
 0x25f   :  { %v940_v45 = vmax.f32 %v875_v41, 0.0 }
 0x260   :  { %v971_v46 = vpack.c.bf16 %v939_v43, %v937_v42 }
 0x261   :  { %v972_v47 = vpack.c.bf16 %v940_v45, %v938_v44 }
 0x263   :  { %1359 = vmatprep.mubr.bf16.mxu0 %v972_v47 }
 0x264   :  { %1360 = vmatmul.mubr.bf16.gmra.mrb[124].mxu0 %v971_v46 }
 0x2bf   :  { %v1211_v50 = vpop.f32.mrb[64].mxu0 }
 0x2c0   :  { %v1212_v35 = vadd.f32 %v1211_v50, %v2801_v36  ;;  %v1213_v51 = vpop.f32.mrb[65].mxu0 }
 0x2c1   :  { %v1214_v52 = vadd.f32 %v1213_v51, %v2804_v48  ;;  %v1215_v53 = vpop.f32.mrb[66].mxu0 }
 0x2c2   :  { %v1216_v54 = vadd.f32 %v1215_v53, %v2801_v36  ;;  %v1217_v55 = vpop.f32.mrb[67].mxu0  ;;  %v1370_v57 = vmax.f32 %v1212_v35, 0.0 }
 0x2c3   :  { %v1218_v56 = vadd.f32 %v1217_v55, %v2804_v48  ;;  %v1371_v59 = vmax.f32 %v1214_v52, 0.0 }
 0x2c4   :  { %v1372_v58 = vmax.f32 %v1216_v54, 0.0 }
 0x2c5   :  { %v1373_v0 = vmax.f32 %v1218_v56, 0.0 }
 0x2c6   :  { %v1434_v60 = vpack.c.bf16 %v1372_v58, %v1370_v57 }
 0x2c7   :  { %v1435_v61 = vpack.c.bf16 %v1373_v0, %v1371_v59  ;;  %v1221_v32 = vpop.f32.mrb[68].mxu0 }
 0x2c8   :  { %v1222_v62 = vadd.f32 %v1221_v32, %v2801_v36  ;;  %v1223_v63 = vpop.f32.mrb[69].mxu0 }
 0x2c9   :  { %v1224_v1 = vadd.f32 %v1223_v63, %v2804_v48  ;;  %v1225_v2 = vpop.f32.mrb[70].mxu0  ;;  %1633 = vmatprep.mubr.bf16.mxu0 %v1435_v61 }
 0x2ca   :  { %v1226_v3 = vadd.f32 %v1225_v2, %v2801_v36  ;;  %v1227_v4 = vpop.f32.mrb[71].mxu0  ;;  %1634 = vmatmul.mubr.bf16.vlgmr.msra.gmra.mrb[128].mxu0 %v1434_v60  ;;  %v1374_v6 = vmax.f32 %v1222_v62, 0.0 }
 0x2cb   :  { %v1228_v5 = vadd.f32 %v1227_v4, %v2804_v48  ;;  %v1375_v8 = vmax.f32 %v1224_v1, 0.0 }
 0x2cc   :  { %v1376_v7 = vmax.f32 %v1226_v3, 0.0 }
 0x2cd   :  { %v1377_v9 = vmax.f32 %v1228_v5, 0.0 }
 0x2ce   :  { %v1436_v10 = vpack.c.bf16 %v1376_v7, %v1374_v6 }
 0x2cf   :  { %v1437_v11 = vpack.c.bf16 %v1377_v9, %v1375_v8  ;;  %v1231_v12 = vpop.f32.mrb[72].mxu0 }
 0x2d0   :  { %v1232_v13 = vadd.f32 %v1231_v12, %v2801_v36  ;;  %v1233_v14 = vpop.f32.mrb[73].mxu0 }
 0x2d1   :  { %v1234_v15 = vadd.f32 %v1233_v14, %v2804_v48  ;;  %v1235_v16 = vpop.f32.mrb[74].mxu0  ;;  %1641 = vmatprep.mubr.bf16.mxu0 %v1437_v11 }
 0x2d2   :  { %v1236_v17 = vadd.f32 %v1235_v16, %v2801_v36  ;;  %v1237_v18 = vpop.f32.mrb[75].mxu0  ;;  %1642 = vmatmul.mubr.bf16.gmra.mrb[132].mxu0 %v1436_v10  ;;  %v1378_v20 = vmax.f32 %v1232_v13, 0.0 }
 0x2d3   :  { %v1238_v19 = vadd.f32 %v1237_v18, %v2804_v48  ;;  %v1379_v22 = vmax.f32 %v1234_v15, 0.0 }
 0x2d4   :  { %v1380_v21 = vmax.f32 %v1236_v17, 0.0 }
 0x2d5   :  { %v1381_v23 = vmax.f32 %v1238_v19, 0.0 }
 0x2d6   :  { %v1438_v24 = vpack.c.bf16 %v1380_v21, %v1378_v20 }
 0x2d7   :  { %v1439_v25 = vpack.c.bf16 %v1381_v23, %v1379_v22  ;;  %v1241_v26 = vpop.f32.mrb[76].mxu0 }
 0x2d8   :  { %v1242_v27 = vadd.f32 %v1241_v26, %v2801_v36  ;;  %v1243_v28 = vpop.f32.mrb[77].mxu0 }
 0x2d9   :  { %v1244_v29 = vadd.f32 %v1243_v28, %v2804_v48  ;;  %v1245_v30 = vpop.f32.mrb[78].mxu0  ;;  %1649 = vmatprep.mubr.bf16.mxu0 %v1439_v25 }
 0x2da   :  { %v1246_v31 = vadd.f32 %v1245_v30, %v2801_v36  ;;  %v1247_v33 = vpop.f32.mrb[79].mxu0  ;;  %1650 = vmatmul.mubr.bf16.gmra.mrb[136].mxu0 %v1438_v24  ;;  %v1382_v37 = vmax.f32 %v1242_v27, 0.0 }
 0x2db   :  { %v1248_v34 = vadd.f32 %v1247_v33, %v2804_v48  ;;  %v1383_v39 = vmax.f32 %v1244_v29, 0.0 }
 0x2dc   :  { %v1384_v38 = vmax.f32 %v1246_v31, 0.0 }
 0x2dd   :  { %v1385_v40 = vmax.f32 %v1248_v34, 0.0 }
 0x2de   :  { %v1440_v41 = vpack.c.bf16 %v1384_v38, %v1382_v37 }
 0x2df   :  { %v1441_v42 = vpack.c.bf16 %v1385_v40, %v1383_v39  ;;  %v1251_v43 = vpop.f32.mrb[80].mxu0 }
 0x2e0   :  { %v1252_v44 = vadd.f32 %v1251_v43, %v2801_v36  ;;  %v1253_v45 = vpop.f32.mrb[81].mxu0 }
 0x2e1   :  { %v1254_v46 = vadd.f32 %v1253_v45, %v2804_v48  ;;  %v1255_v47 = vpop.f32.mrb[82].mxu0  ;;  %1657 = vmatprep.mubr.bf16.mxu1 %v1441_v42 }
 0x2e2   :  { %v1256_v49 = vadd.f32 %v1255_v47, %v2801_v36  ;;  %v1257_v50 = vpop.f32.mrb[83].mxu0  ;;  %1658 = vmatmul.mubr.bf16.vlgmr.msra.gmra.mrb[64].mxu1 %v1440_v41  ;;  %v1386_v51 = vmax.f32 %v1252_v44, 0.0 }
 0x2e3   :  { %v1258_v35 = vadd.f32 %v1257_v50, %v2804_v48  ;;  %v1387_v53 = vmax.f32 %v1254_v46, 0.0 }
 0x2e4   :  { %v1388_v52 = vmax.f32 %v1256_v49, 0.0 }
 0x2e5   :  { %v1389_v54 = vmax.f32 %v1258_v35, 0.0 }
 0x2e6   :  { %v1442_v55 = vpack.c.bf16 %v1388_v52, %v1386_v51 }
 0x2e7   :  { %v1443_v56 = vpack.c.bf16 %v1389_v54, %v1387_v53  ;;  %v1261_v57 = vpop.f32.mrb[84].mxu0 }
 0x2e8   :  { %v1262_v58 = vadd.f32 %v1261_v57, %v2801_v36  ;;  %v1263_v59 = vpop.f32.mrb[85].mxu0 }
 0x2e9   :  { %v1264_v0 = vadd.f32 %v1263_v59, %v2804_v48  ;;  %v1265_v60 = vpop.f32.mrb[86].mxu0  ;;  %1665 = vmatprep.mubr.bf16.mxu1 %v1443_v56 }
 0x2ea   :  { %v1266_v61 = vadd.f32 %v1265_v60, %v2801_v36  ;;  %v1267_v32 = vpop.f32.mrb[87].mxu0  ;;  %1666 = vmatmul.mubr.bf16.gmra.mrb[68].mxu1 %v1442_v55  ;;  %v1390_v63 = vmax.f32 %v1262_v58, 0.0 }
 0x2eb   :  { %v1268_v62 = vadd.f32 %v1267_v32, %v2804_v48  ;;  %v1391_v2 = vmax.f32 %v1264_v0, 0.0 }
 0x2ec   :  { %v1392_v1 = vmax.f32 %v1266_v61, 0.0 }
 0x2ed   :  { %v1393_v3 = vmax.f32 %v1268_v62, 0.0 }
 0x2ee   :  { %v1444_v4 = vpack.c.bf16 %v1392_v1, %v1390_v63 }
 0x2ef   :  { %v1445_v5 = vpack.c.bf16 %v1393_v3, %v1391_v2  ;;  %v1271_v6 = vpop.f32.mrb[88].mxu0 }
 0x2f0   :  { %v1272_v7 = vadd.f32 %v1271_v6, %v2801_v36  ;;  %v1273_v8 = vpop.f32.mrb[89].mxu0 }
 0x2f1   :  { %v1274_v9 = vadd.f32 %v1273_v8, %v2804_v48  ;;  %v1275_v10 = vpop.f32.mrb[90].mxu0  ;;  %1673 = vmatprep.mubr.bf16.mxu1 %v1445_v5 }
 0x2f2   :  { %v1276_v11 = vadd.f32 %v1275_v10, %v2801_v36  ;;  %v1277_v12 = vpop.f32.mrb[91].mxu0  ;;  %1674 = vmatmul.mubr.bf16.gmra.mrb[72].mxu1 %v1444_v4  ;;  %v1394_v14 = vmax.f32 %v1272_v7, 0.0 }
 0x2f3   :  { %v1278_v13 = vadd.f32 %v1277_v12, %v2804_v48  ;;  %v1395_v16 = vmax.f32 %v1274_v9, 0.0 }
 0x2f4   :  { %v1396_v15 = vmax.f32 %v1276_v11, 0.0 }
 0x2f5   :  { %v1397_v17 = vmax.f32 %v1278_v13, 0.0 }
 0x2f6   :  { %v1446_v18 = vpack.c.bf16 %v1396_v15, %v1394_v14 }
 0x2f7   :  { %v1447_v19 = vpack.c.bf16 %v1397_v17, %v1395_v16  ;;  %v1281_v20 = vpop.f32.mrb[92].mxu0 }
 0x2f8   :  { %v1282_v21 = vadd.f32 %v1281_v20, %v2801_v36  ;;  %v1283_v22 = vpop.f32.mrb[93].mxu0 }
 0x2f9   :  { %v1284_v23 = vadd.f32 %v1283_v22, %v2804_v48  ;;  %v1285_v24 = vpop.f32.mrb[94].mxu0  ;;  %1681 = vmatprep.mubr.bf16.mxu1 %v1447_v19 }
 0x2fa   :  { %v1286_v25 = vadd.f32 %v1285_v24, %v2801_v36  ;;  %v1287_v26 = vpop.f32.mrb[95].mxu0  ;;  %1682 = vmatmul.mubr.bf16.gmra.mrb[76].mxu1 %v1446_v18  ;;  %v1398_v28 = vmax.f32 %v1282_v21, 0.0 }
 0x2fb   :  { %v1288_v27 = vadd.f32 %v1287_v26, %v2804_v48  ;;  %v1399_v30 = vmax.f32 %v1284_v23, 0.0 }
 0x2fc   :  { %v1400_v29 = vmax.f32 %v1286_v25, 0.0 }
 0x2fd   :  { %v1401_v31 = vmax.f32 %v1288_v27, 0.0 }
 0x2fe   :  { %v1448_v33 = vpack.c.bf16 %v1400_v29, %v1398_v28 }
 0x2ff   :  { %v1449_v34 = vpack.c.bf16 %v1401_v31, %v1399_v30  ;;  %v1291_v37 = vpop.f32.mrb[96].mxu0 }
 0x300   :  { %v1292_v38 = vadd.f32 %v1291_v37, %v2801_v36  ;;  %v1293_v39 = vpop.f32.mrb[97].mxu0 }
 0x301   :  { %v1294_v40 = vadd.f32 %v1293_v39, %v2804_v48  ;;  %v1295_v41 = vpop.f32.mrb[98].mxu0  ;;  %1689 = vmatprep.mubr.bf16.mxu1 %v1449_v34 }
 0x302   :  { %v1296_v42 = vadd.f32 %v1295_v41, %v2801_v36  ;;  %v1297_v43 = vpop.f32.mrb[99].mxu0  ;;  %1690 = vmatmul.mubr.bf16.gmra.mrb[80].mxu1 %v1448_v33  ;;  %v1402_v45 = vmax.f32 %v1292_v38, 0.0 }
 0x303   :  { %v1298_v44 = vadd.f32 %v1297_v43, %v2804_v48  ;;  %v1403_v47 = vmax.f32 %v1294_v40, 0.0 }
 0x304   :  { %v1404_v46 = vmax.f32 %v1296_v42, 0.0 }
 0x305   :  { %v1405_v49 = vmax.f32 %v1298_v44, 0.0 }
 0x306   :  { %v1450_v50 = vpack.c.bf16 %v1404_v46, %v1402_v45 }
 0x307   :  { %v1451_v35 = vpack.c.bf16 %v1405_v49, %v1403_v47  ;;  %v1301_v51 = vpop.f32.mrb[100].mxu0 }
 0x308   :  { %v1302_v52 = vadd.f32 %v1301_v51, %v2801_v36  ;;  %v1303_v53 = vpop.f32.mrb[101].mxu0 }
 0x309   :  { %v1304_v54 = vadd.f32 %v1303_v53, %v2804_v48  ;;  %v1305_v55 = vpop.f32.mrb[102].mxu0  ;;  %1697 = vmatprep.mubr.bf16.mxu1 %v1451_v35 }
 0x30a   :  { %v1306_v56 = vadd.f32 %v1305_v55, %v2801_v36  ;;  %v1307_v57 = vpop.f32.mrb[103].mxu0  ;;  %1698 = vmatmul.mubr.bf16.gmra.mrb[84].mxu1 %v1450_v50  ;;  %v1406_v59 = vmax.f32 %v1302_v52, 0.0 }
 0x30b   :  { %v1308_v58 = vadd.f32 %v1307_v57, %v2804_v48  ;;  %v1407_v60 = vmax.f32 %v1304_v54, 0.0 }
 0x30c   :  { %v1408_v0 = vmax.f32 %v1306_v56, 0.0 }
 0x30d   :  { %v1409_v61 = vmax.f32 %v1308_v58, 0.0 }
 0x30e   :  { %v1452_v32 = vpack.c.bf16 %v1408_v0, %v1406_v59 }
 0x30f   :  { %v1453_v62 = vpack.c.bf16 %v1409_v61, %v1407_v60  ;;  %v1311_v63 = vpop.f32.mrb[104].mxu0 }
 0x310   :  { %v1312_v1 = vadd.f32 %v1311_v63, %v2801_v36  ;;  %v1313_v2 = vpop.f32.mrb[105].mxu0 }
 0x311   :  { %v1314_v3 = vadd.f32 %v1313_v2, %v2804_v48  ;;  %v1315_v4 = vpop.f32.mrb[106].mxu0  ;;  %1705 = vmatprep.mubr.bf16.mxu1 %v1453_v62 }
 0x312   :  { %v1316_v5 = vadd.f32 %v1315_v4, %v2801_v36  ;;  %v1317_v6 = vpop.f32.mrb[107].mxu0  ;;  %1706 = vmatmul.mubr.bf16.gmra.mrb[88].mxu1 %v1452_v32  ;;  %v1410_v8 = vmax.f32 %v1312_v1, 0.0 }
 0x313   :  { %v1318_v7 = vadd.f32 %v1317_v6, %v2804_v48  ;;  %v1411_v10 = vmax.f32 %v1314_v3, 0.0 }
 0x314   :  { %v1412_v9 = vmax.f32 %v1316_v5, 0.0 }
 0x315   :  { %v1413_v11 = vmax.f32 %v1318_v7, 0.0 }
 0x316   :  { %v1454_v12 = vpack.c.bf16 %v1412_v9, %v1410_v8 }
 0x317   :  { %v1455_v13 = vpack.c.bf16 %v1413_v11, %v1411_v10  ;;  %v1321_v14 = vpop.f32.mrb[108].mxu0 }
 0x318   :  { %v1322_v15 = vadd.f32 %v1321_v14, %v2801_v36  ;;  %v1323_v16 = vpop.f32.mrb[109].mxu0 }
 0x319   :  { %v1324_v17 = vadd.f32 %v1323_v16, %v2804_v48  ;;  %v1325_v18 = vpop.f32.mrb[110].mxu0  ;;  %1713 = vmatprep.mubr.bf16.mxu1 %v1455_v13 }
 0x31a   :  { %v1326_v19 = vadd.f32 %v1325_v18, %v2801_v36  ;;  %v1327_v20 = vpop.f32.mrb[111].mxu0  ;;  %1714 = vmatmul.mubr.bf16.gmra.mrb[92].mxu1 %v1454_v12  ;;  %v1414_v22 = vmax.f32 %v1322_v15, 0.0 }
 0x31b   :  { %v1328_v21 = vadd.f32 %v1327_v20, %v2804_v48  ;;  %v1415_v24 = vmax.f32 %v1324_v17, 0.0 }
 0x31c   :  { %v1416_v23 = vmax.f32 %v1326_v19, 0.0 }
 0x31d   :  { %v1417_v25 = vmax.f32 %v1328_v21, 0.0 }
 0x31e   :  { %v1456_v26 = vpack.c.bf16 %v1416_v23, %v1414_v22  ;;  %v2873_v23 = vld [vmem:[%s2930_s8] ss:$0 sm:$0xff]  ;;  %s2339_s8 = smov [#allocation7]  }
 0x31f   :  { %v1457_v27 = vpack.c.bf16 %v1417_v25, %v1415_v24  ;;  %v1331_v28 = vpop.f32.mrb[112].mxu0  ;;  %s1831_s18 = sshll.u32 %s2339_s8, 4  ;;  %s1832_s18 = int_to_ptr.vmem [resolvable:$true] %s1831_s18 }
 0x320   :  { %v1332_v29 = vadd.f32 %v1331_v28, %v2801_v36  ;;  %v1333_v30 = vpop.f32.mrb[113].mxu0  ;;  %s2303_s7 = scalar_lea.vmem %s1832_s18, 4096  ;;  %p2308_p3 = scmp.lt.s32.totalorder %s1832_s18, %s1832_s18 }
 0x321   :  { %v1334_v31 = vadd.f32 %v1333_v30, %v2804_v48  ;;  %v1335_v33 = vpop.f32.mrb[114].mxu0  ;;  %1721 = vmatprep.mubr.bf16.mxu1 %v1457_v27  ;;  %p2304_p2 = scmp.ne.s32.totalorder %s1832_s18, %s2303_s7  ;;  %p2309_p4 = scmp.lt.s32.totalorder %s2303_s7, %s2303_s7 }
 0x322   :  { %v1336_v34 = vadd.f32 %v1335_v33, %v2801_v36  ;;  %v1337_v37 = vpop.f32.mrb[115].mxu0  ;;  %1722 = vmatmul.mubr.bf16.gmra.mrb[96].mxu1 %v1456_v26  ;;  %v1418_v39 = vmax.f32 %v1332_v29, 0.0 }
 0x323   :  { %v1338_v38 = vadd.f32 %v1337_v37, %v2804_v48  ;;  %v1419_v41 = vmax.f32 %v1334_v31, 0.0  ;;  %p2310_p5 = por %p2309_p4, %p2308_p3 }
 0x324   :  { %v1420_v40 = vmax.f32 %v1336_v34, 0.0 }
 0x325   :  { %v1421_v42 = vmax.f32 %v1338_v38, 0.0  ;;  %p2311_p6 = pnand %p2310_p5, %p2304_p2 }
 0x326   :  { %v1458_v43 = vpack.c.bf16 %v1420_v40, %v1418_v39 }
 0x327   :  { %v1459_v44 = vpack.c.bf16 %v1421_v42, %v1419_v41  ;;  %v1341_v45 = vpop.f32.mrb[116].mxu0 }
 0x328   :  { %v1342_v46 = vadd.f32 %v1341_v45, %v2801_v36  ;;  %v1343_v47 = vpop.f32.mrb[117].mxu0 }
 0x329   :  { %v1344_v49 = vadd.f32 %v1343_v47, %v2804_v48  ;;  %v1345_v50 = vpop.f32.mrb[118].mxu0  ;;  %1729 = vmatprep.mubr.bf16.mxu1 %v1459_v44 }
 0x32a   :  { %v1346_v35 = vadd.f32 %v1345_v50, %v2801_v36  ;;  %v1347_v51 = vpop.f32.mrb[119].mxu0  ;;  %1730 = vmatmul.mubr.bf16.gmra.mrb[100].mxu1 %v1458_v43  ;;  %v1422_v53 = vmax.f32 %v1342_v46, 0.0 }
 0x32b   :  { %v1348_v52 = vadd.f32 %v1347_v51, %v2804_v48  ;;  %v1423_v55 = vmax.f32 %v1344_v49, 0.0 }
 0x32c   :  { %v1424_v54 = vmax.f32 %v1346_v35, 0.0 }
 0x32d   :  { %v1425_v56 = vmax.f32 %v1348_v52, 0.0 }
 0x32e   :  { %v1460_v57 = vpack.c.bf16 %v1424_v54, %v1422_v53 }
 0x32f   :  { %v1461_v58 = vpack.c.bf16 %v1425_v56, %v1423_v55  ;;  %v1351_v59 = vpop.f32.mrb[120].mxu0 }
 0x330   :  { %v1352_v0 = vadd.f32 %v1351_v59, %v2801_v36  ;;  %v1353_v60 = vpop.f32.mrb[121].mxu0 }
 0x331   :  { %v1354_v61 = vadd.f32 %v1353_v60, %v2804_v48  ;;  %v1355_v32 = vpop.f32.mrb[122].mxu0  ;;  %1737 = vmatprep.mubr.bf16.mxu1 %v1461_v58 }
 0x332   :  { %v1356_v62 = vadd.f32 %v1355_v32, %v2801_v36  ;;  %v1357_v63 = vpop.f32.mrb[123].mxu0  ;;  %1738 = vmatmul.mubr.bf16.gmra.mrb[104].mxu1 %v1460_v57  ;;  %v1426_v2 = vmax.f32 %v1352_v0, 0.0 }
 0x333   :  { %v1358_v1 = vadd.f32 %v1357_v63, %v2804_v48  ;;  %v1427_v4 = vmax.f32 %v1354_v61, 0.0 }
 0x334   :  { %v1428_v3 = vmax.f32 %v1356_v62, 0.0 }
 0x335   :  { %v1429_v5 = vmax.f32 %v1358_v1, 0.0 }
 0x336   :  { %v1462_v6 = vpack.c.bf16 %v1428_v3, %v1426_v2 }
 0x337   :  { %v1463_v7 = vpack.c.bf16 %v1429_v5, %v1427_v4  ;;  %v1361_v8 = vpop.f32.mrb[124].mxu0 }
 0x338   :  { %v1362_v9 = vadd.f32 %v1361_v8, %v2801_v36  ;;  %v1363_v10 = vpop.f32.mrb[125].mxu0 }
 0x339   :  { %v1364_v11 = vadd.f32 %v1363_v10, %v2804_v48  ;;  %v1365_v12 = vpop.f32.mrb[126].mxu0  ;;  %1745 = vmatprep.mubr.bf16.mxu1 %v1463_v7 }
 0x33a   :  { %v1366_v13 = vadd.f32 %v1365_v12, %v2801_v36  ;;  %v1367_v14 = vpop.f32.mrb[127].mxu0  ;;  %1746 = vmatmul.mubr.bf16.gmra.mrb[108].mxu1 %v1462_v6  ;;  %v1430_v16 = vmax.f32 %v1362_v9, 0.0 }
 0x33b   :  { %v1368_v15 = vadd.f32 %v1367_v14, %v2804_v48  ;;  %v1431_v18 = vmax.f32 %v1364_v11, 0.0 }
 0x33c   :  { %v1432_v17 = vmax.f32 %v1366_v13, 0.0 }
 0x33d   :  { %v1433_v19 = vmax.f32 %v1368_v15, 0.0 }
 0x33e   :  { %v1464_v20 = vpack.c.bf16 %v1432_v17, %v1430_v16 }
 0x33f   :  { %v1465_v21 = vpack.c.bf16 %v1433_v19, %v1431_v18 }
 0x341   :  { %1753 = vmatprep.mubr.bf16.mxu1 %v1465_v21 }
 0x342   :  { %1754 = vmatmul.mubr.bf16.gmra.mrb[112].mxu1 %v1464_v20 }
 0x39d   :  { %v1959_v22 = vpop.f32.mrb[128].mxu0 }
 0x39e   :  { %v1960_v24 = vpop.f32.mrb[129].mxu0 }
 0x39f   :  { %v1961_v36 = vadd.f32 %v1960_v24, %v1959_v22  ;;  %v1962_v25 = vpop.f32.mrb[130].mxu0 }
 0x3a0   :  { %v1963_v26 = vpop.f32.mrb[131].mxu0 }
 0x3a1   :  { %v1636_v48 = vadd.f32 %v1961_v36, %v2873_v23  ;;  %v1964_v27 = vadd.f32 %v1963_v26, %v1962_v25 }
 0x3a3   :  { %2195 = vtanh.f32 %v1636_v48  ;;  %v1639_v28 = vadd.f32 %v1964_v27, %v2873_v23 }
 0x3a5   :  { %2197 = vtanh.f32 %v1639_v28  ;;  %v1965_v29 = vpop.f32.mrb[132].mxu0 }
 0x3a6   :  { %v1966_v30 = vpop.f32.mrb[133].mxu0 }
 0x3a7   :  { %v1967_v31 = vadd.f32 %v1966_v30, %v1965_v29  ;;  %v1968_v33 = vpop.f32.mrb[134].mxu0 }
 0x3a8   :  { %v1969_v34 = vpop.f32.mrb[135].mxu0 }
 0x3a9   :  { %v1644_v37 = vadd.f32 %v1967_v31, %v2873_v23  ;;  %v1970_v38 = vadd.f32 %v1969_v34, %v1968_v33 }
 0x3ab   :  { %2199 = vtanh.f32 %v1644_v37  ;;  %v1647_v39 = vadd.f32 %v1970_v38, %v2873_v23 }
 0x3ad   :  { %v2196_v40 = vpop.eup %2195  ;;  %2201 = vtanh.f32 %v1647_v39  ;;  %v1971_v41 = vpop.f32.mrb[136].mxu0 }
 0x3ae   :  { %1794 = vst [vmem:[#allocation7] sm:$0xff] %v2196_v40  ;;  %v1972_v42 = vpop.f32.mrb[137].mxu0 }
 0x3af   :  { %v2198_v43 = vpop.eup %2197  ;;  %v1973_v44 = vadd.f32 %v1972_v42, %v1971_v41  ;;  %v1974_v45 = vpop.f32.mrb[138].mxu0 }
 0x3b0   :  { %1795 = vst [vmem:[#allocation7 + $0x8] sm:$0xff] %v2198_v43  ;;  %v1975_v46 = vpop.f32.mrb[139].mxu0 }
 0x3b1   :  { %v1652_v47 = vadd.f32 %v1973_v44, %v2873_v23  ;;  %v1976_v49 = vadd.f32 %v1975_v46, %v1974_v45 }
 0x3b3   :  { %2203 = vtanh.f32 %v1652_v47  ;;  %v1655_v50 = vadd.f32 %v1976_v49, %v2873_v23 }
 0x3b5   :  { %v2200_v35 = vpop.eup %2199  ;;  %2205 = vtanh.f32 %v1655_v50  ;;  %v1977_v51 = vpop.f32.mrb[64].mxu1 }
 0x3b6   :  { %1796 = vst [vmem:[#allocation7 + $0x10] sm:$0xff] %v2200_v35  ;;  %v1978_v52 = vpop.f32.mrb[65].mxu1 }
 0x3b7   :  { %v2202_v53 = vpop.eup %2201  ;;  %v1979_v54 = vadd.f32 %v1978_v52, %v1977_v51  ;;  %v1980_v55 = vpop.f32.mrb[66].mxu1 }
 0x3b8   :  { %1797 = vst [vmem:[#allocation7 + $0x18] sm:$0xff] %v2202_v53  ;;  %v1981_v56 = vpop.f32.mrb[67].mxu1 }
 0x3b9   :  { %v1660_v57 = vadd.f32 %v1979_v54, %v2873_v23  ;;  %v1982_v58 = vadd.f32 %v1981_v56, %v1980_v55 }
 0x3bb   :  { %2207 = vtanh.f32 %v1660_v57  ;;  %v1663_v59 = vadd.f32 %v1982_v58, %v2873_v23 }
 0x3bd   :  { %v2204_v0 = vpop.eup %2203  ;;  %2209 = vtanh.f32 %v1663_v59  ;;  %v1983_v60 = vpop.f32.mrb[68].mxu1 }
 0x3be   :  { %1798 = vst [vmem:[#allocation7 + $0x20] sm:$0xff] %v2204_v0  ;;  %v1984_v61 = vpop.f32.mrb[69].mxu1 }
 0x3bf   :  { %v2206_v32 = vpop.eup %2205  ;;  %v1985_v62 = vadd.f32 %v1984_v61, %v1983_v60  ;;  %v1986_v63 = vpop.f32.mrb[70].mxu1 }
 0x3c0   :  { %1799 = vst [vmem:[#allocation7 + $0x28] sm:$0xff] %v2206_v32  ;;  %v1987_v1 = vpop.f32.mrb[71].mxu1 }
 0x3c1   :  { %v1668_v2 = vadd.f32 %v1985_v62, %v2873_v23  ;;  %v1988_v3 = vadd.f32 %v1987_v1, %v1986_v63 }
 0x3c3   :  { %2211 = vtanh.f32 %v1668_v2  ;;  %v1671_v4 = vadd.f32 %v1988_v3, %v2873_v23 }
 0x3c5   :  { %v2208_v5 = vpop.eup %2207  ;;  %2213 = vtanh.f32 %v1671_v4  ;;  %v1989_v6 = vpop.f32.mrb[72].mxu1 }
 0x3c6   :  { %1800 = vst [vmem:[#allocation7 + $0x30] sm:$0xff] %v2208_v5  ;;  %v1990_v7 = vpop.f32.mrb[73].mxu1 }
 0x3c7   :  { %v2210_v8 = vpop.eup %2209  ;;  %v1991_v9 = vadd.f32 %v1990_v7, %v1989_v6  ;;  %v1992_v10 = vpop.f32.mrb[74].mxu1 }
 0x3c8   :  { %1801 = vst [vmem:[#allocation7 + $0x38] sm:$0xff] %v2210_v8  ;;  %v1993_v11 = vpop.f32.mrb[75].mxu1 }
 0x3c9   :  { %v1676_v12 = vadd.f32 %v1991_v9, %v2873_v23  ;;  %v1994_v13 = vadd.f32 %v1993_v11, %v1992_v10 }
 0x3cb   :  { %2215 = vtanh.f32 %v1676_v12  ;;  %v1679_v14 = vadd.f32 %v1994_v13, %v2873_v23 }
 0x3cd   :  { %v2212_v15 = vpop.eup %2211  ;;  %2217 = vtanh.f32 %v1679_v14  ;;  %v1995_v16 = vpop.f32.mrb[76].mxu1 }
 0x3ce   :  { %1802 = vst [vmem:[#allocation7 + $0x40] sm:$0xff] %v2212_v15  ;;  %v1996_v17 = vpop.f32.mrb[77].mxu1 }
 0x3cf   :  { %v2214_v18 = vpop.eup %2213  ;;  %v1997_v19 = vadd.f32 %v1996_v17, %v1995_v16  ;;  %v1998_v20 = vpop.f32.mrb[78].mxu1 }
 0x3d0   :  { %1803 = vst [vmem:[#allocation7 + $0x48] sm:$0xff] %v2214_v18  ;;  %v1999_v21 = vpop.f32.mrb[79].mxu1 }
 0x3d1   :  { %v1684_v22 = vadd.f32 %v1997_v19, %v2873_v23  ;;  %v2000_v24 = vadd.f32 %v1999_v21, %v1998_v20 }
 0x3d3   :  { %2219 = vtanh.f32 %v1684_v22  ;;  %v1687_v36 = vadd.f32 %v2000_v24, %v2873_v23 }
 0x3d5   :  { %v2216_v25 = vpop.eup %2215  ;;  %2221 = vtanh.f32 %v1687_v36  ;;  %v2001_v26 = vpop.f32.mrb[80].mxu1 }
 0x3d6   :  { %1804 = vst [vmem:[#allocation7 + $0x50] sm:$0xff] %v2216_v25  ;;  %v2002_v48 = vpop.f32.mrb[81].mxu1 }
 0x3d7   :  { %v2218_v27 = vpop.eup %2217  ;;  %v2003_v28 = vadd.f32 %v2002_v48, %v2001_v26  ;;  %v2004_v29 = vpop.f32.mrb[82].mxu1 }
 0x3d8   :  { %1805 = vst [vmem:[#allocation7 + $0x58] sm:$0xff] %v2218_v27  ;;  %v2005_v30 = vpop.f32.mrb[83].mxu1 }
 0x3d9   :  { %v1692_v31 = vadd.f32 %v2003_v28, %v2873_v23  ;;  %v2006_v33 = vadd.f32 %v2005_v30, %v2004_v29 }
 0x3db   :  { %2223 = vtanh.f32 %v1692_v31  ;;  %v1695_v34 = vadd.f32 %v2006_v33, %v2873_v23 }
 0x3dd   :  { %v2220_v37 = vpop.eup %2219  ;;  %2225 = vtanh.f32 %v1695_v34  ;;  %v2007_v38 = vpop.f32.mrb[84].mxu1 }
 0x3de   :  { %1806 = vst [vmem:[#allocation7 + $0x60] sm:$0xff] %v2220_v37  ;;  %v2008_v39 = vpop.f32.mrb[85].mxu1 }
 0x3df   :  { %v2222_v40 = vpop.eup %2221  ;;  %v2009_v41 = vadd.f32 %v2008_v39, %v2007_v38  ;;  %v2010_v42 = vpop.f32.mrb[86].mxu1 }
 0x3e0   :  { %1807 = vst [vmem:[#allocation7 + $0x68] sm:$0xff] %v2222_v40  ;;  %v2011_v43 = vpop.f32.mrb[87].mxu1 }
 0x3e1   :  { %v1700_v44 = vadd.f32 %v2009_v41, %v2873_v23  ;;  %v2012_v45 = vadd.f32 %v2011_v43, %v2010_v42 }
 0x3e3   :  { %2227 = vtanh.f32 %v1700_v44  ;;  %v1703_v46 = vadd.f32 %v2012_v45, %v2873_v23 }
 0x3e5   :  { %v2224_v47 = vpop.eup %2223  ;;  %2229 = vtanh.f32 %v1703_v46  ;;  %v2013_v49 = vpop.f32.mrb[88].mxu1 }
 0x3e6   :  { %1808 = vst [vmem:[#allocation7 + $0x70] sm:$0xff] %v2224_v47  ;;  %v2014_v50 = vpop.f32.mrb[89].mxu1 }
 0x3e7   :  { %v2226_v35 = vpop.eup %2225  ;;  %v2015_v51 = vadd.f32 %v2014_v50, %v2013_v49  ;;  %v2016_v52 = vpop.f32.mrb[90].mxu1 }
 0x3e8   :  { %1809 = vst [vmem:[#allocation7 + $0x78] sm:$0xff] %v2226_v35  ;;  %v2017_v53 = vpop.f32.mrb[91].mxu1 }
 0x3e9   :  { %v1708_v54 = vadd.f32 %v2015_v51, %v2873_v23  ;;  %v2018_v55 = vadd.f32 %v2017_v53, %v2016_v52 }
 0x3eb   :  { %2231 = vtanh.f32 %v1708_v54  ;;  %v1711_v56 = vadd.f32 %v2018_v55, %v2873_v23 }
 0x3ed   :  { %v2228_v57 = vpop.eup %2227  ;;  %2233 = vtanh.f32 %v1711_v56  ;;  %v2019_v58 = vpop.f32.mrb[92].mxu1 }
 0x3ee   :  { %1810 = vst [vmem:[#allocation7 + $0x80] sm:$0xff] %v2228_v57  ;;  %v2020_v59 = vpop.f32.mrb[93].mxu1 }
 0x3ef   :  { %v2230_v0 = vpop.eup %2229  ;;  %v2021_v60 = vadd.f32 %v2020_v59, %v2019_v58  ;;  %v2022_v61 = vpop.f32.mrb[94].mxu1 }
 0x3f0   :  { %1811 = vst [vmem:[#allocation7 + $0x88] sm:$0xff] %v2230_v0  ;;  %v2023_v32 = vpop.f32.mrb[95].mxu1 }
 0x3f1   :  { %v1716_v62 = vadd.f32 %v2021_v60, %v2873_v23  ;;  %v2024_v63 = vadd.f32 %v2023_v32, %v2022_v61 }
 0x3f3   :  { %2235 = vtanh.f32 %v1716_v62  ;;  %v1719_v1 = vadd.f32 %v2024_v63, %v2873_v23 }
 0x3f5   :  { %v2232_v2 = vpop.eup %2231  ;;  %2237 = vtanh.f32 %v1719_v1  ;;  %v2025_v3 = vpop.f32.mrb[96].mxu1 }
 0x3f6   :  { %1812 = vst [vmem:[#allocation7 + $0x90] sm:$0xff] %v2232_v2  ;;  %v2026_v4 = vpop.f32.mrb[97].mxu1 }
 0x3f7   :  { %v2234_v5 = vpop.eup %2233  ;;  %v2027_v6 = vadd.f32 %v2026_v4, %v2025_v3  ;;  %v2028_v7 = vpop.f32.mrb[98].mxu1 }
 0x3f8   :  { %1813 = vst [vmem:[#allocation7 + $0x98] sm:$0xff] %v2234_v5  ;;  %v2029_v8 = vpop.f32.mrb[99].mxu1 }
 0x3f9   :  { %v1724_v9 = vadd.f32 %v2027_v6, %v2873_v23  ;;  %v2030_v10 = vadd.f32 %v2029_v8, %v2028_v7 }
 0x3fb   :  { %2239 = vtanh.f32 %v1724_v9  ;;  %v1727_v11 = vadd.f32 %v2030_v10, %v2873_v23 }
 0x3fd   :  { %v2236_v12 = vpop.eup %2235  ;;  %2241 = vtanh.f32 %v1727_v11  ;;  %v2031_v13 = vpop.f32.mrb[100].mxu1 }
 0x3fe   :  { %1814 = vst [vmem:[#allocation7 + $0xa0] sm:$0xff] %v2236_v12  ;;  %v2032_v14 = vpop.f32.mrb[101].mxu1 }
 0x3ff   :  { %v2238_v15 = vpop.eup %2237  ;;  %v2033_v16 = vadd.f32 %v2032_v14, %v2031_v13  ;;  %v2034_v17 = vpop.f32.mrb[102].mxu1 }
 0x400   :  { %1815 = vst [vmem:[#allocation7 + $0xa8] sm:$0xff] %v2238_v15  ;;  %v2035_v18 = vpop.f32.mrb[103].mxu1 }
 0x401   :  { %v1732_v19 = vadd.f32 %v2033_v16, %v2873_v23  ;;  %v2036_v20 = vadd.f32 %v2035_v18, %v2034_v17 }
 0x403   :  { %2243 = vtanh.f32 %v1732_v19  ;;  %v1735_v21 = vadd.f32 %v2036_v20, %v2873_v23 }
 0x405   :  { %v2240_v22 = vpop.eup %2239  ;;  %2245 = vtanh.f32 %v1735_v21  ;;  %v2037_v24 = vpop.f32.mrb[104].mxu1 }
 0x406   :  { %1816 = vst [vmem:[#allocation7 + $0xb0] sm:$0xff] %v2240_v22  ;;  %v2038_v36 = vpop.f32.mrb[105].mxu1 }
 0x407   :  { %v2242_v25 = vpop.eup %2241  ;;  %v2039_v26 = vadd.f32 %v2038_v36, %v2037_v24  ;;  %v2040_v48 = vpop.f32.mrb[106].mxu1 }
 0x408   :  { %1817 = vst [vmem:[#allocation7 + $0xb8] sm:$0xff] %v2242_v25  ;;  %v2041_v27 = vpop.f32.mrb[107].mxu1 }
 0x409   :  { %v1740_v28 = vadd.f32 %v2039_v26, %v2873_v23  ;;  %v2042_v29 = vadd.f32 %v2041_v27, %v2040_v48 }
 0x40b   :  { %2247 = vtanh.f32 %v1740_v28  ;;  %v1743_v30 = vadd.f32 %v2042_v29, %v2873_v23 }
 0x40d   :  { %v2244_v31 = vpop.eup %2243  ;;  %2249 = vtanh.f32 %v1743_v30  ;;  %v2043_v33 = vpop.f32.mrb[108].mxu1 }
 0x40e   :  { %1818 = vst [vmem:[#allocation7 + $0xc0] sm:$0xff] %v2244_v31  ;;  %v2044_v34 = vpop.f32.mrb[109].mxu1 }
 0x40f   :  { %v2246_v37 = vpop.eup %2245  ;;  %v2045_v38 = vadd.f32 %v2044_v34, %v2043_v33  ;;  %v2046_v39 = vpop.f32.mrb[110].mxu1 }
 0x410   :  { %1819 = vst [vmem:[#allocation7 + $0xc8] sm:$0xff] %v2246_v37  ;;  %v2047_v40 = vpop.f32.mrb[111].mxu1 }
 0x411   :  { %v1748_v41 = vadd.f32 %v2045_v38, %v2873_v23  ;;  %v2048_v42 = vadd.f32 %v2047_v40, %v2046_v39 }
 0x413   :  { %2251 = vtanh.f32 %v1748_v41  ;;  %v1751_v43 = vadd.f32 %v2048_v42, %v2873_v23 }
 0x415   :  { %v2248_v44 = vpop.eup %2247  ;;  %2253 = vtanh.f32 %v1751_v43  ;;  %v2049_v45 = vpop.f32.mrb[112].mxu1 }
 0x416   :  { %1820 = vst [vmem:[#allocation7 + $0xd0] sm:$0xff] %v2248_v44  ;;  %v2050_v46 = vpop.f32.mrb[113].mxu1 }
 0x417   :  { %v2250_v47 = vpop.eup %2249  ;;  %v2051_v49 = vadd.f32 %v2050_v46, %v2049_v45  ;;  %v2052_v50 = vpop.f32.mrb[114].mxu1 }
 0x418   :  { %1821 = vst [vmem:[#allocation7 + $0xd8] sm:$0xff] %v2250_v47  ;;  %v2053_v35 = vpop.f32.mrb[115].mxu1 }
 0x419   :  { %v1756_v51 = vadd.f32 %v2051_v49, %v2873_v23  ;;  %v2054_v52 = vadd.f32 %v2053_v35, %v2052_v50 }
 0x41b   :  { %2255 = vtanh.f32 %v1756_v51  ;;  %v1759_v53 = vadd.f32 %v2054_v52, %v2873_v23 }
 0x41d   :  { %v2252_v54 = vpop.eup %2251  ;;  %2257 = vtanh.f32 %v1759_v53 }
 0x41e   :  { %1822 = vst [vmem:[#allocation7 + $0xe0] sm:$0xff] %v2252_v54 }
 0x41f   :  { %v2254_v55 = vpop.eup %2253 }
 0x420   :  { %1823 = vst [vmem:[#allocation7 + $0xe8] sm:$0xff] %v2254_v55 }
 0x425   :  { %v2256_v56 = vpop.eup %2255 }
 0x426   :  { %1824 = vst [vmem:[#allocation7 + $0xf0] sm:$0xff] %v2256_v56 }
 0x427   :  { %v2258_v57 = vpop.eup %2257 }
 0x428   :  { %1825 = vst [vmem:[#allocation7 + $0xf8] sm:$0xff] %v2258_v57 }
 0x429   :  { %2314 = shalt.err (!%p2311_p6)
}
 0x42a   :  { %s2315_s23 = scalar_lea.hbm %s2931_s9, 4096 }
 0x42b   :  { %p2316_p7 = scmp.ne.s32.totalorder %s2931_s9, %s2315_s23  ;;  %p2319_p8 = scmp.lt.u32.totalorder %s2315_s23, %s2931_s9 }
 0x42d   :  { %p2321_p9 = pnand %p2319_p8, %p2316_p7 }
 0x42f   :  { %2324 = shalt.err (!%p2321_p9)
}
 0x430   :  { %1837 = dma.vmem_to_hbm [thread:$0]  %s1832_s18, 4096, %s2931_s9, [#allocation4], %s2332_s19, %s2332_s19, %s2333_s20  }
 0x431   :  { %2329 = dma.done.wait [#allocation4], 4096  }
 0x432   :  { %2330 = vsyncadd [#allocation4], 4294963200 }
 0x433   :  { %1841 = vsyncpa [#allocation3], 1 }
 0x434   :  { %1842 = vsyncpa [#allocation6], 1 }
 0x435   :  { %1843 = vsyncpa [#allocation4], 1 }

</bundles_post_ra>
